<compile_context>
chip_gen: v6e
topology: v6e:2x2x1
jax: 0.10.0
libtpu: 0.0.40
codegen_flags: <defaults>
</compile_context>

<pallas_src>
import functools

import jax
import jax.numpy as jnp
from jax.experimental import pallas as pl
from jax.experimental.pallas import tpu as pltpu

HID = 256          # hidden width of every TDNN layer in Net
LANE = 128
SUB = 16           # sublane granularity for bf16-friendly row blocks
SLACK = 16         # zeroed tail rows so ctx-3 shifted reads stay in-bounds
BN_EPS = 1e-5
TARGET_ROWS = 512  # aim for >=256 MXU rows per grid step (>=128 on v5e)


def _round_up(x, m):
    return (x + m - 1) // m * m


def _const_spec(shape):
    """Full-array block with a constant index map (weights / epi table).
    Requests single-buffering when supported: the block never changes across
    the grid, so double-buffering it only wastes VMEM."""
    idx = lambda b: (0,) * len(shape)
    if hasattr(pl, "Buffered"):
        try:
            return pl.BlockSpec(shape, idx, pipeline_mode=pl.Buffered(1))
        except TypeError:
            pass
    return pl.BlockSpec(shape, idx)


# ----------------------------------------------------------------------------
# Pallas kernel: whole 6-layer net fused; one grid step per BB-item batch block.
# ----------------------------------------------------------------------------
def _net_kernel(x_ref, w1_ref, w2_ref, w3_ref, w4_ref, w5_ref, w6_ref,
                epi_ref, o_ref, act_ref, *, rows, nout):
    f32 = jnp.float32
    act_dt = act_ref.dtype

    def epilogue(y, layer, outer_relu, n=HID):
        e = epi_ref[layer]                       # (8, HID) f32, sublane-clean
        bias, scale, shift = e[0:1, :n], e[1:2, :n], e[2:3, :n]
        y = jnp.maximum(y + bias, 0.0)           # Linear bias + TDNN-internal ReLU
        y = y * scale + shift                    # BatchNorm1d (eval), dropout_p = 0
        if outer_relu:
            y = jnp.maximum(y, 0.0)              # inter-layer ReLU from Net.forward
        return y

    def store(a):
        act_ref[pl.ds(0, rows), :] = a.astype(act_dt)

    def ctx3(w_ref):
        # In-kernel unfold for a context-3 layer: three time-shifted reads of
        # the resident activation slab, summed as three bf16 MXU dots against
        # the context-split weight slabs (f32 accumulate).
        y = jnp.dot(act_ref[pl.ds(0, rows), :], w_ref[0],
                    preferred_element_type=f32)
        y = y + jnp.dot(act_ref[pl.ds(1, rows), :], w_ref[1],
                        preferred_element_type=f32)
        y = y + jnp.dot(act_ref[pl.ds(2, rows), :], w_ref[2],
                        preferred_element_type=f32)
        return y

    # Zero the scratch tail so shifted reads past the last item stay finite.
    act_ref[pl.ds(rows, SLACK), :] = jnp.zeros((SLACK, HID), act_dt)

    # Layer 1: context-3 pre-unfolded in the wrapper -> one aligned K=128 dot.
    store(epilogue(jnp.dot(x_ref[...], w1_ref[...],
                           preferred_element_type=f32), 0, True))
    # Layers 2, 3: context 3 (in-kernel unfold).
    store(epilogue(ctx3(w2_ref), 1, True))
    store(epilogue(ctx3(w3_ref), 2, True))
    # Layers 4, 5: context 1.
    store(epilogue(jnp.dot(act_ref[pl.ds(0, rows), :], w4_ref[...],
                           preferred_element_type=f32), 3, True))
    store(epilogue(jnp.dot(act_ref[pl.ds(0, rows), :], w5_ref[...],
                           preferred_element_type=f32), 4, True))
    # Final layer: context 1, no outer ReLU; N lane-padded to 128.
    y = epilogue(jnp.dot(act_ref[pl.ds(0, rows), :], w6_ref[...],
                         preferred_element_type=f32), 5, False, n=nout)
    o_ref[...] = y.astype(o_ref.dtype)


# ----------------------------------------------------------------------------
# Jitted forward wrapper.
# ----------------------------------------------------------------------------
def _net_forward_impl(x, prep, *, num_classes):
    B, T, C = x.shape
    assert T >= 7, "Net's three context-3 layers shrink time by 6; need T >= 7"
    cin_pad = prep["w1"].shape[0]
    nout = prep["w6"].shape[1]

    t_item = _round_up(T, SUB)                  # sublane-aligned slab per item
    bb = max(1, min(B, TARGET_ROWS // t_item))  # batch items packed per step
    num_blocks = pl.cdiv(B, bb)
    b_pad = num_blocks * bb
    rows = bb * t_item                          # MXU M dimension per grid step
    # TODO(synk): for very long sequences add a time-tile grid axis with a
    # 2-row halo per ctx-3 layer instead of growing `rows` unboundedly.

    # Layer-1 unfold hoisted here: frames[t] = [x[t], x[t+1], x[t+2]].
    xf = x.astype(jnp.float32)
    xt = jnp.pad(xf, ((0, 0), (0, 2), (0, 0)))
    frames = jnp.concatenate([xt[:, 0:T], xt[:, 1:T + 1], xt[:, 2:T + 2]],
                             axis=-1)                            # (B, T, 3C)
    frames = jnp.pad(frames, ((0, b_pad - B), (0, t_item - T),
                              (0, cin_pad - 3 * C)))
    frames = frames.reshape(num_blocks * rows, cin_pad).astype(jnp.bfloat16)

    # Explicit VMEM budget (input dbl-buf + output dbl-buf + scratch + weights).
    weight_bytes = sum(prep[k].size * prep[k].dtype.itemsize
                       for k in ("w1", "w2", "w3", "w4", "w5", "w6", "epi"))
    est = (2 * rows * cin_pad * 2 + 2 * rows * nout * 4
           + (rows + SLACK) * HID * 2 + 2 * weight_bytes)
    vmem_limit = int(min(100 << 20, max(32 << 20, 2 * est)))

    kernel = functools.partial(_net_kernel, rows=rows, nout=nout)
    out = pl.pallas_call(
        kernel,
        out_shape=jax.ShapeDtypeStruct((num_blocks * rows, nout), jnp.float32),
        grid=(num_blocks,),
        in_specs=[
            pl.BlockSpec((rows, cin_pad), lambda b: (b, 0)),
            _const_spec((cin_pad, HID)),
            _const_spec((3, HID, HID)),
            _const_spec((3, HID, HID)),
            _const_spec((HID, HID)),
            _const_spec((HID, HID)),
            _const_spec((HID, nout)),
            _const_spec((6, 8, HID)),
        ],
        out_specs=pl.BlockSpec((rows, nout), lambda b: (b, 0)),
        scratch_shapes=[pltpu.VMEM((rows + SLACK, HID), jnp.bfloat16)],
        compiler_params=pltpu.CompilerParams(
            dimension_semantics=("parallel",),
            vmem_limit_bytes=vmem_limit),
    )(frames, prep["w1"], prep["w2"], prep["w3"], prep["w4"], prep["w5"],
      prep["w6"], prep["epi"])

    out = out.reshape(b_pad, t_item, nout)
    t_out = T - 6   # three context-3 (dilation 1) layers each shrink time by 2
    return out[:B, :t_out, :num_classes]


net_forward = jax.jit(_net_forward_impl, static_argnames=("num_classes",))


# ----------------------------------------------------------------------------
# Parameter init (matches the synthetic TDNN/Net of the reference) and the
# one-time, hoisted packing into kernel-ready arrays.
# ----------------------------------------------------------------------------
def init_tdnn_params(key, input_dim, output_dim, context_size):
    kw, kb = jax.random.split(key)
    fan_in = input_dim * context_size
    w = jax.random.normal(kw, (output_dim, fan_in), jnp.float32) / jnp.sqrt(
        jnp.float32(fan_in))
    b = jax.random.normal(kb, (output_dim,), jnp.float32) * 0.01
    gamma = jnp.ones((output_dim,), jnp.float32)
    beta = jnp.zeros((output_dim,), jnp.float32)
    run_mean = jnp.zeros((output_dim,), jnp.float32)
    run_var = jnp.ones((output_dim,), jnp.float32)
    return (w, b, gamma, beta, run_mean, run_var)


def init_net_params(key, in_size, num_classes):
    keys = jax.random.split(key, 6)
    cfg = [
        (in_size, 256, 3, 1),
        (256, 256, 3, 1),
        (256, 256, 3, 1),
        (256, 256, 1, 1),
        (256, 256, 1, 1),
        (256, num_classes, 1, 1),
    ]
    params = []
    for k, (ind, outd, ctx, dil) in zip(keys, cfg):
        params.append((init_tdnn_params(k, ind, outd, ctx), ctx, dil))
    return params


def prepare_params(net_params, in_size, num_classes):
    """One-time packing: transposed / context-split bf16 weights, folded BN
    affine, lane + sublane padding.  Done at init time, NOT per forward call."""
    assert num_classes <= HID  # TODO(synk): tile N if num_classes > 256
    cin_pad = _round_up(3 * in_size, LANE)
    nout = _round_up(num_classes, LANE)
    bf16 = jnp.bfloat16

    def ctx_split(w, cin):
        # (out, 3*cin) with context-major columns -> (3, cin, out)
        out_dim = w.shape[0]
        return jnp.transpose(w.reshape(out_dim, 3, cin), (1, 2, 0))

    (w1, *_), ctx1, dil1 = net_params[0]
    assert ctx1 == 3 and dil1 == 1
    w1p = jnp.pad(w1.T, ((0, cin_pad - 3 * in_size), (0, 0))).astype(bf16)
    w2p = ctx_split(net_params[1][0][0], HID).astype(bf16)
    w3p = ctx_split(net_params[2][0][0], HID).astype(bf16)
    w4p = net_params[3][0][0].T.astype(bf16)
    w5p = net_params[4][0][0].T.astype(bf16)
    w6p = jnp.pad(net_params[5][0][0].T,
                  ((0, 0), (0, nout - num_classes))).astype(bf16)

    rows = []
    for (p, _, _) in net_params:
        _, b, gamma, beta, mean, var = p
        scale = gamma / jnp.sqrt(var + BN_EPS)
        shift = beta - mean * scale
        pad = (0, HID - b.shape[0])
        row = jnp.stack([jnp.pad(b, pad), jnp.pad(scale, pad),
                         jnp.pad(shift, pad)])               # (3, HID)
        rows.append(jnp.pad(row, ((0, 8 - 3), (0, 0))))      # sublane-pad to 8
    epi = jnp.stack(rows).astype(jnp.float32)                # (6, 8, HID)

    return dict(w1=w1p, w2=w2p, w3=w3p, w4=w4p, w5=w5p, w6=w6p, epi=epi)


# ----------------------------------------------------------------------------
# Pure-JAX reference (mirrors the PyTorch Net forward, eval-mode BN, f32).
# ----------------------------------------------------------------------------
def _reference_forward(x, net_params):
    a = x
    n = len(net_params)
    for idx, (p, ctx, dil) in enumerate(net_params):
        w, b, gamma, beta, mean, var = p
        B, T, C = a.shape
        t_out = T - dil * (ctx - 1)
        if ctx == 1:
            frames = a
        else:
            frames = jnp.concatenate(
                [a[:, c * dil: c * dil + t_out, :] for c in range(ctx)],
                axis=-1)
        y = frames.reshape(B * t_out, C * ctx) @ w.T + b
        y = jnp.maximum(y, 0.0)
        scale = gamma / jnp.sqrt(var + BN_EPS)
        y = y * scale + (beta - mean * scale)
        if idx < n - 1:
            y = jnp.maximum(y, 0.0)
        a = y.reshape(B, t_out, -1)
    return a


if __name__ == "__main__":
    key = jax.random.PRNGKey(0)
    k_in, k_par = jax.random.split(key)

    B, T, IN_SIZE, NUM_CLASSES = 2, 16, 32, 8
    x = jax.random.normal(k_in, (B, T, IN_SIZE), jnp.float32)

    net_params = init_net_params(k_par, IN_SIZE, NUM_CLASSES)
    prep = prepare_params(net_params, IN_SIZE, NUM_CLASSES)

    out = net_forward(x, prep, num_classes=NUM_CLASSES)
    out = jax.block_until_ready(out)

    # Three context-3 layers each shrink time by 2: 16 -> 10
    assert out.shape == (B, T - 6, NUM_CLASSES), out.shape
    assert bool(jnp.all(jnp.isfinite(out)))

    ref = _reference_forward(x, net_params)
    # bf16 matmul operands (f32 accumulate) vs the f32 reference -> 2e-2 tol.
    assert bool(jnp.allclose(out, ref, rtol=2e-2, atol=2e-2)), float(
        jnp.max(jnp.abs(out - ref)))

    print("KERNEL_OK")
</pallas_src>

<mosaic_0001>
module attributes {stable_mosaic.version = 11 : i64} {
  func.func @_net_kernel(%arg0: i32, %arg1: memref<32x128xbf16, #tpu.memory_space<vmem>>, %arg2: memref<128x256xbf16, #tpu.memory_space<vmem>>, %arg3: memref<3x256x256xbf16, #tpu.memory_space<vmem>>, %arg4: memref<3x256x256xbf16, #tpu.memory_space<vmem>>, %arg5: memref<256x256xbf16, #tpu.memory_space<vmem>>, %arg6: memref<256x256xbf16, #tpu.memory_space<vmem>>, %arg7: memref<256x128xbf16, #tpu.memory_space<vmem>>, %arg8: memref<6x8x256xf32, #tpu.memory_space<vmem>>, %arg9: memref<32x128xf32, #tpu.memory_space<vmem>>, %arg10: memref<48x256xbf16, #tpu.memory_space<vmem>>) attributes {dimension_semantics = [#tpu.dimension_semantics<parallel>], iteration_bounds = array<i64: 1>, scalar_prefetch = 0 : i64, scratch_operands = 1 : i64, tpu.core_type = #tpu.core_type<tc>, window_params = [{transform_indices = @transform_0, window_bounds = array<i64: 32, 128>}, {pipeline_mode = #tpu.pipeline_mode<synchronous>, transform_indices = @transform_1, window_bounds = array<i64: 128, 256>}, {pipeline_mode = #tpu.pipeline_mode<synchronous>, transform_indices = @transform_2, window_bounds = array<i64: 3, 256, 256>}, {pipeline_mode = #tpu.pipeline_mode<synchronous>, transform_indices = @transform_3, window_bounds = array<i64: 3, 256, 256>}, {pipeline_mode = #tpu.pipeline_mode<synchronous>, transform_indices = @transform_4, window_bounds = array<i64: 256, 256>}, {pipeline_mode = #tpu.pipeline_mode<synchronous>, transform_indices = @transform_5, window_bounds = array<i64: 256, 256>}, {pipeline_mode = #tpu.pipeline_mode<synchronous>, transform_indices = @transform_6, window_bounds = array<i64: 256, 128>}, {pipeline_mode = #tpu.pipeline_mode<synchronous>, transform_indices = @transform_7, window_bounds = array<i64: 6, 8, 256>}, {transform_indices = @transform_8, window_bounds = array<i64: 32, 128>}]} {
    %cst = arith.constant 0.000000e+00 : bf16
    %0 = vector.broadcast %cst : bf16 to vector<16x256xbf16>
    %c32 = arith.constant 32 : index
    %c0 = arith.constant 0 : index
    %1 = vector.load %arg10[%c32, %c0] : memref<48x256xbf16, #tpu.memory_space<vmem>>, vector<16x256xbf16>
    tpu.vector_store %arg10[%c32, %c0], %0 {strides = array<i32>} : memref<48x256xbf16, #tpu.memory_space<vmem>>, vector<16x256xbf16>,
    %c0_0 = arith.constant 0 : index
    %c0_1 = arith.constant 0 : index
    %2 = vector.load %arg1[%c0_0, %c0_1] : memref<32x128xbf16, #tpu.memory_space<vmem>>, vector<32x128xbf16>
    %c0_2 = arith.constant 0 : index
    %c0_3 = arith.constant 0 : index
    %3 = vector.load %arg2[%c0_2, %c0_3] : memref<128x256xbf16, #tpu.memory_space<vmem>>, vector<128x256xbf16>
    %cst_4 = arith.constant dense<0.000000e+00> : vector<32x256xf32>
    %4 = tpu.matmul %2, %3, %cst_4 {dimension_numbers = #tpu.dot_dimension_numbers<[1], [0], [0], [1], [0, 0, 1, 1], [], []>} : vector<32x128xbf16>, vector<128x256xbf16>, vector<32x256xf32> -> vector<32x256xf32>
    %c0_5 = arith.constant 0 : index
    %c0_6 = arith.constant 0 : index
    %c0_7 = arith.constant 0 : index
    %5 = vector.load %arg8[%c0_5, %c0_6, %c0_7] : memref<6x8x256xf32, #tpu.memory_space<vmem>>, vector<1x8x256xf32>
    %6 = vector.shape_cast %5 : vector<1x8x256xf32> to vector<8x256xf32>
    %7 = vector.extract_strided_slice %6 {offsets = [0, 0], sizes = [1, 256], strides = [1, 1]} : vector<8x256xf32> to vector<1x256xf32>
    %8 = vector.extract_strided_slice %6 {offsets = [1, 0], sizes = [1, 256], strides = [1, 1]} : vector<8x256xf32> to vector<1x256xf32>
    %9 = vector.extract_strided_slice %6 {offsets = [2, 0], sizes = [1, 256], strides = [1, 1]} : vector<8x256xf32> to vector<1x256xf32>
    %10 = vector.broadcast %7 : vector<1x256xf32> to vector<32x256xf32>
    %11 = arith.addf %4, %10 : vector<32x256xf32>
    %cst_8 = arith.constant 0.000000e+00 : f32
    %12 = vector.broadcast %cst_8 : f32 to vector<32x256xf32>
    %13 = arith.maximumf %11, %12 : vector<32x256xf32>
    %14 = vector.broadcast %8 : vector<1x256xf32> to vector<32x256xf32>
    %15 = arith.mulf %13, %14 : vector<32x256xf32>
    %16 = vector.broadcast %9 : vector<1x256xf32> to vector<32x256xf32>
    %17 = arith.addf %15, %16 : vector<32x256xf32>
    %cst_9 = arith.constant 0.000000e+00 : f32
    %18 = vector.broadcast %cst_9 : f32 to vector<32x256xf32>
    %19 = arith.maximumf %17, %18 : vector<32x256xf32>
    %20 = arith.truncf %19 : vector<32x256xf32> to vector<32x256xbf16>
    %c0_10 = arith.constant 0 : index
    %c0_11 = arith.constant 0 : index
    %21 = vector.load %arg10[%c0_10, %c0_11] : memref<48x256xbf16, #tpu.memory_space<vmem>>, vector<32x256xbf16>
    tpu.vector_store %arg10[%c0_10, %c0_11], %20 {strides = array<i32>} : memref<48x256xbf16, #tpu.memory_space<vmem>>, vector<32x256xbf16>,
    %c0_12 = arith.constant 0 : index
    %c0_13 = arith.constant 0 : index
    %22 = vector.load %arg10[%c0_12, %c0_13] : memref<48x256xbf16, #tpu.memory_space<vmem>>, vector<32x256xbf16>
    %c0_14 = arith.constant 0 : index
    %c0_15 = arith.constant 0 : index
    %c0_16 = arith.constant 0 : index
    %23 = vector.load %arg3[%c0_14, %c0_15, %c0_16] : memref<3x256x256xbf16, #tpu.memory_space<vmem>>, vector<1x256x256xbf16>
    %24 = vector.shape_cast %23 : vector<1x256x256xbf16> to vector<256x256xbf16>
    %cst_17 = arith.constant dense<0.000000e+00> : vector<32x256xf32>
    %25 = tpu.matmul %22, %24, %cst_17 {dimension_numbers = #tpu.dot_dimension_numbers<[1], [0], [0], [1], [0, 0, 1, 1], [], []>} : vector<32x256xbf16>, vector<256x256xbf16>, vector<32x256xf32> -> vector<32x256xf32>
    %c1 = arith.constant 1 : index
    %c0_18 = arith.constant 0 : index
    %26 = vector.load %arg10[%c1, %c0_18] : memref<48x256xbf16, #tpu.memory_space<vmem>>, vector<32x256xbf16>
    %c1_19 = arith.constant 1 : index
    %c0_20 = arith.constant 0 : index
    %c0_21 = arith.constant 0 : index
    %27 = vector.load %arg3[%c1_19, %c0_20, %c0_21] : memref<3x256x256xbf16, #tpu.memory_space<vmem>>, vector<1x256x256xbf16>
    %28 = vector.shape_cast %27 : vector<1x256x256xbf16> to vector<256x256xbf16>
    %cst_22 = arith.constant dense<0.000000e+00> : vector<32x256xf32>
    %29 = tpu.matmul %26, %28, %cst_22 {dimension_numbers = #tpu.dot_dimension_numbers<[1], [0], [0], [1], [0, 0, 1, 1], [], []>} : vector<32x256xbf16>, vector<256x256xbf16>, vector<32x256xf32> -> vector<32x256xf32>
    %30 = arith.addf %25, %29 : vector<32x256xf32>
    %c2 = arith.constant 2 : index
    %c0_23 = arith.constant 0 : index
    %31 = vector.load %arg10[%c2, %c0_23] : memref<48x256xbf16, #tpu.memory_space<vmem>>, vector<32x256xbf16>
    %c2_24 = arith.constant 2 : index
    %c0_25 = arith.constant 0 : index
    %c0_26 = arith.constant 0 : index
    %32 = vector.load %arg3[%c2_24, %c0_25, %c0_26] : memref<3x256x256xbf16, #tpu.memory_space<vmem>>, vector<1x256x256xbf16>
    %33 = vector.shape_cast %32 : vector<1x256x256xbf16> to vector<256x256xbf16>
    %cst_27 = arith.constant dense<0.000000e+00> : vector<32x256xf32>
    %34 = tpu.matmul %31, %33, %cst_27 {dimension_numbers = #tpu.dot_dimension_numbers<[1], [0], [0], [1], [0, 0, 1, 1], [], []>} : vector<32x256xbf16>, vector<256x256xbf16>, vector<32x256xf32> -> vector<32x256xf32>
    %35 = arith.addf %30, %34 : vector<32x256xf32>
    %c1_28 = arith.constant 1 : index
    %c0_29 = arith.constant 0 : index
    %c0_30 = arith.constant 0 : index
    %36 = vector.load %arg8[%c1_28, %c0_29, %c0_30] : memref<6x8x256xf32, #tpu.memory_space<vmem>>, vector<1x8x256xf32>
    %37 = vector.shape_cast %36 : vector<1x8x256xf32> to vector<8x256xf32>
    %38 = vector.extract_strided_slice %37 {offsets = [0, 0], sizes = [1, 256], strides = [1, 1]} : vector<8x256xf32> to vector<1x256xf32>
    %39 = vector.extract_strided_slice %37 {offsets = [1, 0], sizes = [1, 256], strides = [1, 1]} : vector<8x256xf32> to vector<1x256xf32>
    %40 = vector.extract_strided_slice %37 {offsets = [2, 0], sizes = [1, 256], strides = [1, 1]} : vector<8x256xf32> to vector<1x256xf32>
    %41 = vector.broadcast %38 : vector<1x256xf32> to vector<32x256xf32>
    %42 = arith.addf %35, %41 : vector<32x256xf32>
    %cst_31 = arith.constant 0.000000e+00 : f32
    %43 = vector.broadcast %cst_31 : f32 to vector<32x256xf32>
    %44 = arith.maximumf %42, %43 : vector<32x256xf32>
    %45 = vector.broadcast %39 : vector<1x256xf32> to vector<32x256xf32>
    %46 = arith.mulf %44, %45 : vector<32x256xf32>
    %47 = vector.broadcast %40 : vector<1x256xf32> to vector<32x256xf32>
    %48 = arith.addf %46, %47 : vector<32x256xf32>
    %cst_32 = arith.constant 0.000000e+00 : f32
    %49 = vector.broadcast %cst_32 : f32 to vector<32x256xf32>
    %50 = arith.maximumf %48, %49 : vector<32x256xf32>
    %51 = arith.truncf %50 : vector<32x256xf32> to vector<32x256xbf16>
    %c0_33 = arith.constant 0 : index
    %c0_34 = arith.constant 0 : index
    %52 = vector.load %arg10[%c0_33, %c0_34] : memref<48x256xbf16, #tpu.memory_space<vmem>>, vector<32x256xbf16>
    tpu.vector_store %arg10[%c0_33, %c0_34], %51 {strides = array<i32>} : memref<48x256xbf16, #tpu.memory_space<vmem>>, vector<32x256xbf16>,
    %c0_35 = arith.constant 0 : index
    %c0_36 = arith.constant 0 : index
    %53 = vector.load %arg10[%c0_35, %c0_36] : memref<48x256xbf16, #tpu.memory_space<vmem>>, vector<32x256xbf16>
    %c0_37 = arith.constant 0 : index
    %c0_38 = arith.constant 0 : index
    %c0_39 = arith.constant 0 : index
    %54 = vector.load %arg4[%c0_37, %c0_38, %c0_39] : memref<3x256x256xbf16, #tpu.memory_space<vmem>>, vector<1x256x256xbf16>
    %55 = vector.shape_cast %54 : vector<1x256x256xbf16> to vector<256x256xbf16>
    %cst_40 = arith.constant dense<0.000000e+00> : vector<32x256xf32>
    %56 = tpu.matmul %53, %55, %cst_40 {dimension_numbers = #tpu.dot_dimension_numbers<[1], [0], [0], [1], [0, 0, 1, 1], [], []>} : vector<32x256xbf16>, vector<256x256xbf16>, vector<32x256xf32> -> vector<32x256xf32>
    %c1_41 = arith.constant 1 : index
    %c0_42 = arith.constant 0 : index
    %57 = vector.load %arg10[%c1_41, %c0_42] : memref<48x256xbf16, #tpu.memory_space<vmem>>, vector<32x256xbf16>
    %c1_43 = arith.constant 1 : index
    %c0_44 = arith.constant 0 : index
    %c0_45 = arith.constant 0 : index
    %58 = vector.load %arg4[%c1_43, %c0_44, %c0_45] : memref<3x256x256xbf16, #tpu.memory_space<vmem>>, vector<1x256x256xbf16>
    %59 = vector.shape_cast %58 : vector<1x256x256xbf16> to vector<256x256xbf16>
    %cst_46 = arith.constant dense<0.000000e+00> : vector<32x256xf32>
    %60 = tpu.matmul %57, %59, %cst_46 {dimension_numbers = #tpu.dot_dimension_numbers<[1], [0], [0], [1], [0, 0, 1, 1], [], []>} : vector<32x256xbf16>, vector<256x256xbf16>, vector<32x256xf32> -> vector<32x256xf32>
    %61 = arith.addf %56, %60 : vector<32x256xf32>
    %c2_47 = arith.constant 2 : index
    %c0_48 = arith.constant 0 : index
    %62 = vector.load %arg10[%c2_47, %c0_48] : memref<48x256xbf16, #tpu.memory_space<vmem>>, vector<32x256xbf16>
    %c2_49 = arith.constant 2 : index
    %c0_50 = arith.constant 0 : index
    %c0_51 = arith.constant 0 : index
    %63 = vector.load %arg4[%c2_49, %c0_50, %c0_51] : memref<3x256x256xbf16, #tpu.memory_space<vmem>>, vector<1x256x256xbf16>
    %64 = vector.shape_cast %63 : vector<1x256x256xbf16> to vector<256x256xbf16>
    %cst_52 = arith.constant dense<0.000000e+00> : vector<32x256xf32>
    %65 = tpu.matmul %62, %64, %cst_52 {dimension_numbers = #tpu.dot_dimension_numbers<[1], [0], [0], [1], [0, 0, 1, 1], [], []>} : vector<32x256xbf16>, vector<256x256xbf16>, vector<32x256xf32> -> vector<32x256xf32>
    %66 = arith.addf %61, %65 : vector<32x256xf32>
    %c2_53 = arith.constant 2 : index
    %c0_54 = arith.constant 0 : index
    %c0_55 = arith.constant 0 : index
    %67 = vector.load %arg8[%c2_53, %c0_54, %c0_55] : memref<6x8x256xf32, #tpu.memory_space<vmem>>, vector<1x8x256xf32>
    %68 = vector.shape_cast %67 : vector<1x8x256xf32> to vector<8x256xf32>
    %69 = vector.extract_strided_slice %68 {offsets = [0, 0], sizes = [1, 256], strides = [1, 1]} : vector<8x256xf32> to vector<1x256xf32>
    %70 = vector.extract_strided_slice %68 {offsets = [1, 0], sizes = [1, 256], strides = [1, 1]} : vector<8x256xf32> to vector<1x256xf32>
    %71 = vector.extract_strided_slice %68 {offsets = [2, 0], sizes = [1, 256], strides = [1, 1]} : vector<8x256xf32> to vector<1x256xf32>
    %72 = vector.broadcast %69 : vector<1x256xf32> to vector<32x256xf32>
    %73 = arith.addf %66, %72 : vector<32x256xf32>
    %cst_56 = arith.constant 0.000000e+00 : f32
    %74 = vector.broadcast %cst_56 : f32 to vector<32x256xf32>
    %75 = arith.maximumf %73, %74 : vector<32x256xf32>
    %76 = vector.broadcast %70 : vector<1x256xf32> to vector<32x256xf32>
    %77 = arith.mulf %75, %76 : vector<32x256xf32>
    %78 = vector.broadcast %71 : vector<1x256xf32> to vector<32x256xf32>
    %79 = arith.addf %77, %78 : vector<32x256xf32>
    %cst_57 = arith.constant 0.000000e+00 : f32
    %80 = vector.broadcast %cst_57 : f32 to vector<32x256xf32>
    %81 = arith.maximumf %79, %80 : vector<32x256xf32>
    %82 = arith.truncf %81 : vector<32x256xf32> to vector<32x256xbf16>
    %c0_58 = arith.constant 0 : index
    %c0_59 = arith.constant 0 : index
    %83 = vector.load %arg10[%c0_58, %c0_59] : memref<48x256xbf16, #tpu.memory_space<vmem>>, vector<32x256xbf16>
    tpu.vector_store %arg10[%c0_58, %c0_59], %82 {strides = array<i32>} : memref<48x256xbf16, #tpu.memory_space<vmem>>, vector<32x256xbf16>,
    %c0_60 = arith.constant 0 : index
    %c0_61 = arith.constant 0 : index
    %84 = vector.load %arg10[%c0_60, %c0_61] : memref<48x256xbf16, #tpu.memory_space<vmem>>, vector<32x256xbf16>
    %c0_62 = arith.constant 0 : index
    %c0_63 = arith.constant 0 : index
    %85 = vector.load %arg5[%c0_62, %c0_63] : memref<256x256xbf16, #tpu.memory_space<vmem>>, vector<256x256xbf16>
    %cst_64 = arith.constant dense<0.000000e+00> : vector<32x256xf32>
    %86 = tpu.matmul %84, %85, %cst_64 {dimension_numbers = #tpu.dot_dimension_numbers<[1], [0], [0], [1], [0, 0, 1, 1], [], []>} : vector<32x256xbf16>, vector<256x256xbf16>, vector<32x256xf32> -> vector<32x256xf32>
    %c3 = arith.constant 3 : index
    %c0_65 = arith.constant 0 : index
    %c0_66 = arith.constant 0 : index
    %87 = vector.load %arg8[%c3, %c0_65, %c0_66] : memref<6x8x256xf32, #tpu.memory_space<vmem>>, vector<1x8x256xf32>
    %88 = vector.shape_cast %87 : vector<1x8x256xf32> to vector<8x256xf32>
    %89 = vector.extract_strided_slice %88 {offsets = [0, 0], sizes = [1, 256], strides = [1, 1]} : vector<8x256xf32> to vector<1x256xf32>
    %90 = vector.extract_strided_slice %88 {offsets = [1, 0], sizes = [1, 256], strides = [1, 1]} : vector<8x256xf32> to vector<1x256xf32>
    %91 = vector.extract_strided_slice %88 {offsets = [2, 0], sizes = [1, 256], strides = [1, 1]} : vector<8x256xf32> to vector<1x256xf32>
    %92 = vector.broadcast %89 : vector<1x256xf32> to vector<32x256xf32>
    %93 = arith.addf %86, %92 : vector<32x256xf32>
    %cst_67 = arith.constant 0.000000e+00 : f32
    %94 = vector.broadcast %cst_67 : f32 to vector<32x256xf32>
    %95 = arith.maximumf %93, %94 : vector<32x256xf32>
    %96 = vector.broadcast %90 : vector<1x256xf32> to vector<32x256xf32>
    %97 = arith.mulf %95, %96 : vector<32x256xf32>
    %98 = vector.broadcast %91 : vector<1x256xf32> to vector<32x256xf32>
    %99 = arith.addf %97, %98 : vector<32x256xf32>
    %cst_68 = arith.constant 0.000000e+00 : f32
    %100 = vector.broadcast %cst_68 : f32 to vector<32x256xf32>
    %101 = arith.maximumf %99, %100 : vector<32x256xf32>
    %102 = arith.truncf %101 : vector<32x256xf32> to vector<32x256xbf16>
    %c0_69 = arith.constant 0 : index
    %c0_70 = arith.constant 0 : index
    %103 = vector.load %arg10[%c0_69, %c0_70] : memref<48x256xbf16, #tpu.memory_space<vmem>>, vector<32x256xbf16>
    tpu.vector_store %arg10[%c0_69, %c0_70], %102 {strides = array<i32>} : memref<48x256xbf16, #tpu.memory_space<vmem>>, vector<32x256xbf16>,
    %c0_71 = arith.constant 0 : index
    %c0_72 = arith.constant 0 : index
    %104 = vector.load %arg10[%c0_71, %c0_72] : memref<48x256xbf16, #tpu.memory_space<vmem>>, vector<32x256xbf16>
    %c0_73 = arith.constant 0 : index
    %c0_74 = arith.constant 0 : index
    %105 = vector.load %arg6[%c0_73, %c0_74] : memref<256x256xbf16, #tpu.memory_space<vmem>>, vector<256x256xbf16>
    %cst_75 = arith.constant dense<0.000000e+00> : vector<32x256xf32>
    %106 = tpu.matmul %104, %105, %cst_75 {dimension_numbers = #tpu.dot_dimension_numbers<[1], [0], [0], [1], [0, 0, 1, 1], [], []>} : vector<32x256xbf16>, vector<256x256xbf16>, vector<32x256xf32> -> vector<32x256xf32>
    %c4 = arith.constant 4 : index
    %c0_76 = arith.constant 0 : index
    %c0_77 = arith.constant 0 : index
    %107 = vector.load %arg8[%c4, %c0_76, %c0_77] : memref<6x8x256xf32, #tpu.memory_space<vmem>>, vector<1x8x256xf32>
    %108 = vector.shape_cast %107 : vector<1x8x256xf32> to vector<8x256xf32>
    %109 = vector.extract_strided_slice %108 {offsets = [0, 0], sizes = [1, 256], strides = [1, 1]} : vector<8x256xf32> to vector<1x256xf32>
    %110 = vector.extract_strided_slice %108 {offsets = [1, 0], sizes = [1, 256], strides = [1, 1]} : vector<8x256xf32> to vector<1x256xf32>
    %111 = vector.extract_strided_slice %108 {offsets = [2, 0], sizes = [1, 256], strides = [1, 1]} : vector<8x256xf32> to vector<1x256xf32>
    %112 = vector.broadcast %109 : vector<1x256xf32> to vector<32x256xf32>
    %113 = arith.addf %106, %112 : vector<32x256xf32>
    %cst_78 = arith.constant 0.000000e+00 : f32
    %114 = vector.broadcast %cst_78 : f32 to vector<32x256xf32>
    %115 = arith.maximumf %113, %114 : vector<32x256xf32>
    %116 = vector.broadcast %110 : vector<1x256xf32> to vector<32x256xf32>
    %117 = arith.mulf %115, %116 : vector<32x256xf32>
    %118 = vector.broadcast %111 : vector<1x256xf32> to vector<32x256xf32>
    %119 = arith.addf %117, %118 : vector<32x256xf32>
    %cst_79 = arith.constant 0.000000e+00 : f32
    %120 = vector.broadcast %cst_79 : f32 to vector<32x256xf32>
    %121 = arith.maximumf %119, %120 : vector<32x256xf32>
    %122 = arith.truncf %121 : vector<32x256xf32> to vector<32x256xbf16>
    %c0_80 = arith.constant 0 : index
    %c0_81 = arith.constant 0 : index
    %123 = vector.load %arg10[%c0_80, %c0_81] : memref<48x256xbf16, #tpu.memory_space<vmem>>, vector<32x256xbf16>
    tpu.vector_store %arg10[%c0_80, %c0_81], %122 {strides = array<i32>} : memref<48x256xbf16, #tpu.memory_space<vmem>>, vector<32x256xbf16>,
    %c0_82 = arith.constant 0 : index
    %c0_83 = arith.constant 0 : index
    %124 = vector.load %arg10[%c0_82, %c0_83] : memref<48x256xbf16, #tpu.memory_space<vmem>>, vector<32x256xbf16>
    %c0_84 = arith.constant 0 : index
    %c0_85 = arith.constant 0 : index
    %125 = vector.load %arg7[%c0_84, %c0_85] : memref<256x128xbf16, #tpu.memory_space<vmem>>, vector<256x128xbf16>
    %cst_86 = arith.constant dense<0.000000e+00> : vector<32x128xf32>
    %126 = tpu.matmul %124, %125, %cst_86 {dimension_numbers = #tpu.dot_dimension_numbers<[1], [0], [0], [1], [0, 0, 1, 1], [], []>} : vector<32x256xbf16>, vector<256x128xbf16>, vector<32x128xf32> -> vector<32x128xf32>
    %c5 = arith.constant 5 : index
    %c0_87 = arith.constant 0 : index
    %c0_88 = arith.constant 0 : index
    %127 = vector.load %arg8[%c5, %c0_87, %c0_88] : memref<6x8x256xf32, #tpu.memory_space<vmem>>, vector<1x8x256xf32>
    %128 = vector.shape_cast %127 : vector<1x8x256xf32> to vector<8x256xf32>
    %129 = vector.extract_strided_slice %128 {offsets = [0, 0], sizes = [1, 128], strides = [1, 1]} : vector<8x256xf32> to vector<1x128xf32>
    %130 = vector.extract_strided_slice %128 {offsets = [1, 0], sizes = [1, 128], strides = [1, 1]} : vector<8x256xf32> to vector<1x128xf32>
    %131 = vector.extract_strided_slice %128 {offsets = [2, 0], sizes = [1, 128], strides = [1, 1]} : vector<8x256xf32> to vector<1x128xf32>
    %132 = vector.broadcast %129 : vector<1x128xf32> to vector<32x128xf32>
    %133 = arith.addf %126, %132 : vector<32x128xf32>
    %cst_89 = arith.constant 0.000000e+00 : f32
    %134 = vector.broadcast %cst_89 : f32 to vector<32x128xf32>
    %135 = arith.maximumf %133, %134 : vector<32x128xf32>
    %136 = vector.broadcast %130 : vector<1x128xf32> to vector<32x128xf32>
    %137 = arith.mulf %135, %136 : vector<32x128xf32>
    %138 = vector.broadcast %131 : vector<1x128xf32> to vector<32x128xf32>
    %139 = arith.addf %137, %138 : vector<32x128xf32>
    %c0_90 = arith.constant 0 : index
    %c0_91 = arith.constant 0 : index
    %140 = vector.load %arg9[%c0_90, %c0_91] : memref<32x128xf32, #tpu.memory_space<vmem>>, vector<32x128xf32>
    tpu.vector_store %arg9[%c0_90, %c0_91], %139 {strides = array<i32>} : memref<32x128xf32, #tpu.memory_space<vmem>>, vector<32x128xf32>,
    return
  }
  func.func @transform_0(%arg0: i32) -> (i32, i32) {
    %c0_i32 = arith.constant 0 : i32
    %c0_i32_0 = arith.constant 0 : i32
    return %arg0, %c0_i32 : i32, i32
  }
  func.func @transform_1(%arg0: i32) -> (i32, i32) {
    %c0_i32 = arith.constant 0 : i32
    %c0_i32_0 = arith.constant 0 : i32
    %c0_i32_1 = arith.constant 0 : i32
    return %c0_i32, %c0_i32_0 : i32, i32
  }
  func.func @transform_2(%arg0: i32) -> (i32, i32, i32) {
    %c0_i32 = arith.constant 0 : i32
    %c0_i32_0 = arith.constant 0 : i32
    %c0_i32_1 = arith.constant 0 : i32
    %c0_i32_2 = arith.constant 0 : i32
    return %c0_i32, %c0_i32_0, %c0_i32_1 : i32, i32, i32
  }
  func.func @transform_3(%arg0: i32) -> (i32, i32, i32) {
    %c0_i32 = arith.constant 0 : i32
    %c0_i32_0 = arith.constant 0 : i32
    %c0_i32_1 = arith.constant 0 : i32
    %c0_i32_2 = arith.constant 0 : i32
    return %c0_i32, %c0_i32_0, %c0_i32_1 : i32, i32, i32
  }
  func.func @transform_4(%arg0: i32) -> (i32, i32) {
    %c0_i32 = arith.constant 0 : i32
    %c0_i32_0 = arith.constant 0 : i32
    %c0_i32_1 = arith.constant 0 : i32
    return %c0_i32, %c0_i32_0 : i32, i32
  }
  func.func @transform_5(%arg0: i32) -> (i32, i32) {
    %c0_i32 = arith.constant 0 : i32
    %c0_i32_0 = arith.constant 0 : i32
    %c0_i32_1 = arith.constant 0 : i32
    return %c0_i32, %c0_i32_0 : i32, i32
  }
  func.func @transform_6(%arg0: i32) -> (i32, i32) {
    %c0_i32 = arith.constant 0 : i32
    %c0_i32_0 = arith.constant 0 : i32
    %c0_i32_1 = arith.constant 0 : i32
    return %c0_i32, %c0_i32_0 : i32, i32
  }
  func.func @transform_7(%arg0: i32) -> (i32, i32, i32) {
    %c0_i32 = arith.constant 0 : i32
    %c0_i32_0 = arith.constant 0 : i32
    %c0_i32_1 = arith.constant 0 : i32
    %c0_i32_2 = arith.constant 0 : i32
    return %c0_i32, %c0_i32_0, %c0_i32_1 : i32, i32, i32
  }
  func.func @transform_8(%arg0: i32) -> (i32, i32) {
    %c0_i32 = arith.constant 0 : i32
    %c0_i32_0 = arith.constant 0 : i32
    return %arg0, %c0_i32 : i32, i32
  }
}

</mosaic_0001>

<bundles_post_ra>
// kernel: _net_forward_impl.1
= control target key start
LH: loop header
LB: loop body
LE: loop exit
PB: predicated region body
PF: predicated region fallthrough
CT: control target
= control target key end

     0   :  { %13 = vsyncpa [#allocation4], 0  ;;  %s4420_s0 = inlined_call_operand.vmem [shape: bf16[32,128], index: 0, kind: input, shape index: {}]   ;;  %s4421_s1 = inlined_call_operand.vmem [shape: bf16[128,256], index: 1, kind: input, shape index: {}]   ;;  %s4422_s2 = inlined_call_operand.hbm [shape: bf16[3,256,256], index: 2, kind: input, shape index: {}]   ;;  %s4423_s3 = inlined_call_operand.hbm [shape: bf16[3,256,256], index: 3, kind: input, shape index: {}]   ;;  %s4424_s4 = inlined_call_operand.hbm [shape: bf16[256,256], index: 4, kind: input, shape index: {}]   ;;  %s4425_s5 = inlined_call_operand.hbm [shape: bf16[256,256], index: 5, kind: input, shape index: {}]   ;;  %s4426_s6 = inlined_call_operand.hbm [shape: bf16[256,128], index: 6, kind: input, shape index: {}]   ;;  %s4427_s7 = inlined_call_operand.hbm [shape: f32[6,8,256], index: 7, kind: input, shape index: {}]   ;;  %s4428_s8 = inlined_call_operand.vmem [shape: f32[32,128], index: 8, kind: output, shape index: {}]  }
   0x1   :  { %14 = vsyncpa [#allocation6], 0 }
   0x2   :  { %15 = vsyncpa [#allocation9], 0 }
   0x3   :  { %16 = vsyncpa [#allocation12], 0  ;;  %s4163_s27 = smov [#allocation5]   ;;  %s4164_s29 = smov [#allocation8]  }
   0x4   :  { %s38_s28 = sshll.u32 %s4163_s27, 4  ;;  %s62_s30 = sshll.u32 %s4164_s29, 4  ;;  %s39_s28 = int_to_ptr.vmem [resolvable:$true] %s38_s28  ;;  %s63_s30 = int_to_ptr.vmem [resolvable:$true] %s62_s30 }
   0x5   :  { %s4043_s9 = scalar_lea.vmem %s39_s28, 12288  ;;  %p4048_p1 = scmp.lt.s32.totalorder %s39_s28, %s39_s28 }
   0x6   :  { %p4044_p0 = scmp.ne.s32.totalorder %s39_s28, %s4043_s9  ;;  %p4049_p2 = scmp.lt.s32.totalorder %s4043_s9, %s4043_s9 }
   0x8   :  { %p4050_p3 = por %p4049_p2, %p4048_p1 }
   0xa   :  { %p4051_p4 = pnand %p4050_p3, %p4044_p0 }
   0xc   :  { %4054 = shalt.err (!%p4051_p4)
}
   0xd   :  { %s4165_s10 = smov 128   ;;  %s4166_s11 = smov 8  }
   0xe   :  { %44 = dma.hbm_to_vmem [thread:$0]  %s4423_s3, 12288, %s39_s28, [#allocation6], %s4165_s10, %s4165_s10, %s4166_s11  }
   0xf   :  { %s4063_s14 = scalar_lea.vmem %s63_s30, 4096  ;;  %p4068_p6 = scmp.lt.s32.totalorder %s63_s30, %s63_s30 }
  0x10   :  { %p4064_p5 = scmp.ne.s32.totalorder %s63_s30, %s4063_s14  ;;  %p4069_p7 = scmp.lt.s32.totalorder %s4063_s14, %s4063_s14 }
  0x12   :  { %p4070_p8 = por %p4069_p7, %p4068_p6 }
  0x14   :  { %p4071_p9 = pnand %p4070_p8, %p4064_p5 }
  0x16   :  { %4074 = shalt.err (!%p4071_p9)
}
  0x17   :  { %68 = dma.hbm_to_vmem [thread:$0]  %s4425_s5, 4096, %s63_s30, [#allocation9], %s4165_s10, %s4165_s10, %s4166_s11  }
  0x18   :  { %s4167_s17 = smov [#allocation3]   ;;  %s4168_s19 = smov [#allocation7]  }
  0x19   :  { %s26_s18 = sshll.u32 %s4167_s17, 4  ;;  %s50_s20 = sshll.u32 %s4168_s19, 4  ;;  %s27_s18 = int_to_ptr.vmem [resolvable:$true] %s26_s18  ;;  %s51_s20 = int_to_ptr.vmem [resolvable:$true] %s50_s20 }
  0x1a   :  { %s4083_s3 = scalar_lea.vmem %s27_s18, 12288  ;;  %p4088_p11 = scmp.lt.s32.totalorder %s27_s18, %s27_s18 }
  0x1b   :  { %p4084_p10 = scmp.ne.s32.totalorder %s27_s18, %s4083_s3  ;;  %p4089_p12 = scmp.lt.s32.totalorder %s4083_s3, %s4083_s3 }
  0x1d   :  { %p4090_p13 = por %p4089_p12, %p4088_p11 }
  0x1f   :  { %p4091_p0 = pnand %p4090_p13, %p4084_p10 }
  0x21   :  { %4094 = shalt.err (!%p4091_p0)
}
  0x22   :  { %32 = dma.hbm_to_vmem [thread:$0]  %s4422_s2, 12288, %s27_s18, [#allocation4], %s4165_s10, %s4165_s10, %s4166_s11  }
  0x23   :  { %s4103_s5 = scalar_lea.vmem %s51_s20, 4096  ;;  %p4108_p2 = scmp.lt.s32.totalorder %s51_s20, %s51_s20 }
  0x24   :  { %p4104_p1 = scmp.ne.s32.totalorder %s51_s20, %s4103_s5  ;;  %p4109_p3 = scmp.lt.s32.totalorder %s4103_s5, %s4103_s5 }
  0x26   :  { %p4110_p4 = por %p4109_p3, %p4108_p2 }
  0x28   :  { %p4111_p5 = pnand %p4110_p4, %p4104_p1 }
  0x2a   :  { %4114 = shalt.err (!%p4111_p5)
}
  0x2b   :  { %56 = dma.hbm_to_vmem [thread:$0]  %s4424_s4, 4096, %s51_s20, [#allocation6], %s4165_s10, %s4165_s10, %s4166_s11  }
  0x2c   :  { %s4169_s25 = smov [#allocation10]  }
  0x2d   :  { %s74_s26 = sshll.u32 %s4169_s25, 4  ;;  %s75_s26 = int_to_ptr.vmem [resolvable:$true] %s74_s26 }
  0x2e   :  { %s4123_s27 = scalar_lea.vmem %s75_s26, 2048  ;;  %p4128_p7 = scmp.lt.s32.totalorder %s75_s26, %s75_s26 }
  0x2f   :  { %p4124_p6 = scmp.ne.s32.totalorder %s75_s26, %s4123_s27  ;;  %p4129_p8 = scmp.lt.s32.totalorder %s4123_s27, %s4123_s27 }
  0x31   :  { %p4130_p9 = por %p4129_p8, %p4128_p7 }
  0x33   :  { %p4131_p10 = pnand %p4130_p9, %p4124_p6 }
  0x35   :  { %4134 = shalt.err (!%p4131_p10)
}
  0x36   :  { %s4170_s2 = smov 64   ;;  %s4171_s28 = smov 4  }
  0x37   :  { %80 = dma.hbm_to_vmem [thread:$0]  %s4426_s6, 2048, %s75_s26, [#allocation9], %s4170_s2, %s4170_s2, %s4171_s28  }
  0x38   :  { %s4172_s9 = smov [#allocation11]  }
  0x39   :  { %s86_s12 = sshll.u32 %s4172_s9, 4  ;;  %s87_s12 = int_to_ptr.vmem [resolvable:$true] %s86_s12 }
  0x3a   :  { %s4143_s4 = scalar_lea.vmem %s87_s12, 1536  ;;  %p4148_p12 = scmp.lt.s32.totalorder %s87_s12, %s87_s12 }
  0x3b   :  { %p4144_p11 = scmp.ne.s32.totalorder %s87_s12, %s4143_s4  ;;  %p4149_p13 = scmp.lt.s32.totalorder %s4143_s4, %s4143_s4 }
  0x3d   :  { %p4150_p0 = por %p4149_p13, %p4148_p12 }
  0x3f   :  { %p4151_p1 = pnand %p4150_p0, %p4144_p11 }
  0x41   :  { %4154 = shalt.err (!%p4151_p1)
}
  0x42   :  { %s4173_s10 = smov 256   ;;  %s4174_s11 = smov 16  }
  0x43   :  { %92 = dma.hbm_to_vmem [thread:$0]  %s4427_s7, 1536, %s87_s12, [#allocation12], %s4173_s10, %s4173_s10, %s4174_s11  }
  0x44   :  { %4155 = dma.done.wait [#allocation4], 12288  }
  0x45   :  { %4156 = vsyncadd [#allocation4], 4294955008 }
  0x46   :  { %4157 = dma.done.wait [#allocation6], 16384  }
  0x47   :  { %4158 = vsyncadd [#allocation6], 4294950912 }
  0x48   :  { %4159 = dma.done.wait [#allocation9], 6144  }
  0x49   :  { %4160 = vsyncadd [#allocation9], 4294961152 }
  0x4a   :  { %4161 = dma.done.wait [#allocation12], 1536  }
  0x4b   :  { %4162 = vsyncadd [#allocation12], 4294965760  ;;  %v4175_v0 = vmov 0   ;;  %v3585_v1 = vld [vmem:[%s4421_s1 + $0x74] ss:$8 sps:$4 sm:$0xff]   ;;  %v3609_v25 = vld [vmem:[%s4420_s0] sm:$0xff]  }
  0x4c   :  { %112 = vst [vmem:[#allocation2 + $0x18] sm:$0xff] %v4175_v0  ;;  %268 = vmatprep.mubr.bf16.mxu0 %v4175_v0  ;;  %v3587_v2 = vld [vmem:[%s4421_s1 + $0x70] ss:$8 sps:$4 sm:$0xff]   ;;  %236 = vmatprep.subr.bf16.mxu0 %v3585_v1  ;;  %v3588_v3 = vld [vmem:[%s4421_s1 + $0x64] ss:$8 sps:$4 sm:$0xff]   ;;  %vm970_vm1 = vcmask 1046528  }
  0x4d   :  { %237 = vmatpush1.bf16.msra.mxu0 %v3587_v2  ;;  %v3590_v4 = vld [vmem:[%s4421_s1 + $0x60] ss:$8 sps:$4 sm:$0xff]   ;;  %v3591_v5 = vld [vmem:[%s4421_s1 + $0x54] ss:$8 sps:$4 sm:$0xff]   ;;  %v3593_v6 = vld [vmem:[%s4421_s1 + $0x50] ss:$8 sps:$4 sm:$0xff]  }
  0x4e   :  { %238 = vmatprep.subr.bf16.mxu0 %v3588_v3  ;;  %v3594_v7 = vld [vmem:[%s4421_s1 + $0x44] ss:$8 sps:$4 sm:$0xff]   ;;  %v3596_v8 = vld [vmem:[%s4421_s1 + $0x40] ss:$8 sps:$4 sm:$0xff]   ;;  %v3597_v9 = vld [vmem:[%s4421_s1 + $0x34] ss:$8 sps:$4 sm:$0xff]  }
  0x4f   :  { %v3599_v10 = vld [vmem:[%s4421_s1 + $0x30] ss:$8 sps:$4 sm:$0xff]   ;;  %v3600_v11 = vld [vmem:[%s4421_s1 + $0x24] ss:$8 sps:$4 sm:$0xff]   ;;  %v3602_v13 = vld [vmem:[%s4421_s1 + $0x20] ss:$8 sps:$4 sm:$0xff]  }
  0x50   :  { %v3620_v12 = vld [vmem:[#allocation3 + $0x174] ss:$8 sps:$4 sm:$0xff]   ;;  %v3603_v14 = vld [vmem:[%s4421_s1 + $0x14] ss:$8 sps:$4 sm:$0xff]   ;;  %v3625_v15 = vld [vmem:[#allocation3 + $0x170] ss:$8 sps:$4 sm:$0xff]  }
  0x51   :  { %239 = vmatpush1.bf16.msra.mxu0 %v3590_v4  ;;  %661 = vmatprep.subr.bf16.mxu1 %v3620_v12  ;;  %v3626_v16 = vld [vmem:[#allocation3 + $0x164] ss:$8 sps:$4 sm:$0xff]   ;;  %v3631_v17 = vld [vmem:[#allocation3 + $0x160] ss:$8 sps:$4 sm:$0xff]   ;;  %v3632_v18 = vld [vmem:[#allocation3 + $0x154] ss:$8 sps:$4 sm:$0xff]  }
  0x52   :  { %240 = vmatprep.subr.bf16.mxu0 %v3591_v5  ;;  %662 = vmatpush1.bf16.msra.mxu1 %v3625_v15  ;;  %v3605_v19 = vld [vmem:[%s4421_s1 + $0x10] ss:$8 sps:$4 sm:$0xff]   ;;  %v3606_v20 = vld [vmem:[%s4421_s1 + $0x4] ss:$8 sps:$4 sm:$0xff]   ;;  %v3637_v21 = vld [vmem:[#allocation3 + $0x150] ss:$8 sps:$4 sm:$0xff]  }
  0x53   :  { %663 = vmatprep.subr.bf16.mxu1 %v3626_v16  ;;  %v3638_v22 = vld [vmem:[#allocation3 + $0x144] ss:$8 sps:$4 sm:$0xff]   ;;  %v3608_v23 = vld [vmem:[%s4421_s1] ss:$8 sps:$4 sm:$0xff]   ;;  %v3613_v24 = vld [vmem:[#allocation3 + $0x74] ss:$8 sps:$4 sm:$0xff]  }
  0x54   :  { %v3643_v26 = vld [vmem:[#allocation3 + $0x140] ss:$8 sps:$4 sm:$0xff]   ;;  %v3644_v27 = vld [vmem:[#allocation3 + $0x134] ss:$8 sps:$4 sm:$0xff]   ;;  %v3611_v28 = vld [vmem:[#allocation3 + $0x70] ss:$8 sps:$4 sm:$0xff]  }
  0x55   :  { %241 = vmatpush1.bf16.msra.mxu0 %v3593_v6  ;;  %v3616_v29 = vld [vmem:[#allocation3 + $0x64] ss:$8 sps:$4 sm:$0xff]   ;;  %v3649_v30 = vld [vmem:[#allocation3 + $0x130] ss:$8 sps:$4 sm:$0xff]   ;;  %v3614_v32 = vld [vmem:[#allocation3 + $0x60] ss:$8 sps:$4 sm:$0xff]  }
  0x56   :  { %242 = vmatprep.subr.bf16.mxu0 %v3594_v7  ;;  %664 = vmatpush1.bf16.msra.mxu1 %v3631_v17  ;;  %v3650_v31 = vld [vmem:[#allocation3 + $0x124] ss:$8 sps:$4 sm:$0xff]   ;;  %v3619_v33 = vld [vmem:[#allocation3 + $0x54] ss:$8 sps:$4 sm:$0xff]   ;;  %v3655_v34 = vld [vmem:[#allocation3 + $0x120] ss:$8 sps:$4 sm:$0xff]  }
  0x57   :  { %665 = vmatprep.subr.bf16.mxu1 %v3632_v18  ;;  %v3610_v35 = vld [vmem:[%s4420_s0 + $0x8] sm:$0xff]   ;;  %v3624_v37 = vld [vmem:[#allocation3 + $0x44] ss:$8 sps:$4 sm:$0xff]   ;;  %v3622_v38 = vld [vmem:[#allocation3 + $0x40] ss:$8 sps:$4 sm:$0xff]  }
  0x58   :  { %v3617_v36 = vld [vmem:[#allocation3 + $0x50] ss:$8 sps:$4 sm:$0xff]   ;;  %v3630_v39 = vld [vmem:[#allocation3 + $0x34] ss:$8 sps:$4 sm:$0xff]   ;;  %v3636_v41 = vld [vmem:[#allocation3 + $0x24] ss:$8 sps:$4 sm:$0xff]  }
  0x59   :  { %243 = vmatpush1.bf16.msra.mxu0 %v3596_v8  ;;  %v3628_v40 = vld [vmem:[#allocation3 + $0x30] ss:$8 sps:$4 sm:$0xff]   ;;  %v3634_v42 = vld [vmem:[#allocation3 + $0x20] ss:$8 sps:$4 sm:$0xff]   ;;  %v3642_v43 = vld [vmem:[#allocation3 + $0x14] ss:$8 sps:$4 sm:$0xff]  }
  0x5a   :  { %244 = vmatprep.subr.bf16.mxu0 %v3597_v9  ;;  %666 = vmatpush1.bf16.msra.mxu1 %v3637_v21  ;;  %v3640_v44 = vld [vmem:[#allocation3 + $0x10] ss:$8 sps:$4 sm:$0xff]   ;;  %v3648_v45 = vld [vmem:[#allocation3 + $0x4] ss:$8 sps:$4 sm:$0xff]   ;;  %v3646_v46 = vld [vmem:[#allocation3] ss:$8 sps:$4 sm:$0xff]  }
  0x5b   :  { %667 = vmatprep.subr.bf16.mxu1 %v3638_v22  ;;  %v3654_v47 = vld [vmem:[#allocation3 + $0xf4] ss:$8 sps:$4 sm:$0xff]   ;;  %v3652_v48 = vld [vmem:[#allocation3 + $0xf0] ss:$8 sps:$4 sm:$0xff]   ;;  %v3660_v50 = vld [vmem:[#allocation3 + $0xe4] ss:$8 sps:$4 sm:$0xff]  }
  0x5c   :  { %v3656_v49 = vld [vmem:[#allocation3 + $0x114] ss:$8 sps:$4 sm:$0xff]   ;;  %v3658_v51 = vld [vmem:[#allocation3 + $0xe0] ss:$8 sps:$4 sm:$0xff]   ;;  %v3661_v52 = vld [vmem:[#allocation3 + $0x110] ss:$8 sps:$4 sm:$0xff]  }
  0x5d   :  { %245 = vmatpush1.bf16.msra.mxu0 %v3599_v10  ;;  %v3662_v53 = vld [vmem:[#allocation3 + $0x104] ss:$8 sps:$4 sm:$0xff]   ;;  %v3666_v54 = vld [vmem:[#allocation3 + $0xd4] ss:$8 sps:$4 sm:$0xff]   ;;  %v3664_v55 = vld [vmem:[#allocation3 + $0xd0] ss:$8 sps:$4 sm:$0xff]  }
  0x5e   :  { %246 = vmatprep.subr.bf16.mxu0 %v3600_v11  ;;  %668 = vmatpush1.bf16.msra.mxu1 %v3643_v26  ;;  %v3667_v56 = vld [vmem:[#allocation3 + $0x100] ss:$8 sps:$4 sm:$0xff]   ;;  %v3668_v57 = vld [vmem:[#allocation3 + $0x1f4] ss:$8 sps:$4 sm:$0xff]   ;;  %v3672_v58 = vld [vmem:[#allocation3 + $0xc4] ss:$8 sps:$4 sm:$0xff]  }
  0x5f   :  { %669 = vmatprep.subr.bf16.mxu1 %v3644_v27  ;;  %v3670_v59 = vld [vmem:[#allocation3 + $0xc0] ss:$8 sps:$4 sm:$0xff]   ;;  %v3673_v60 = vld [vmem:[#allocation3 + $0x1f0] ss:$8 sps:$4 sm:$0xff]   ;;  %v3674_v61 = vld [vmem:[#allocation3 + $0x1e4] ss:$8 sps:$4 sm:$0xff]  }
  0x60   :  { %v3678_v62 = vld [vmem:[#allocation3 + $0xb4] ss:$8 sps:$4 sm:$0xff]   ;;  %v3676_v63 = vld [vmem:[#allocation3 + $0xb0] ss:$8 sps:$4 sm:$0xff]   ;;  %v3684_v2 = vld [vmem:[#allocation3 + $0xa4] ss:$8 sps:$4 sm:$0xff]  }
  0x61   :  { %247 = vmatpush1.bf16.msra.mxu0 %v3602_v13  ;;  %v3680_v1 = vld [vmem:[#allocation3 + $0x1d4] ss:$8 sps:$4 sm:$0xff]   ;;  %v3682_v3 = vld [vmem:[#allocation3 + $0xa0] ss:$8 sps:$4 sm:$0xff]   ;;  %v3685_v4 = vld [vmem:[#allocation3 + $0x1d0] ss:$8 sps:$4 sm:$0xff]  }
  0x62   :  { %248 = vmatprep.subr.bf16.mxu0 %v3603_v14  ;;  %670 = vmatpush1.bf16.msra.mxu1 %v3649_v30  ;;  %v3686_v5 = vld [vmem:[#allocation3 + $0x1c4] ss:$8 sps:$4 sm:$0xff]   ;;  %v3690_v6 = vld [vmem:[#allocation3 + $0x94] ss:$8 sps:$4 sm:$0xff]   ;;  %v3688_v7 = vld [vmem:[#allocation3 + $0x90] ss:$8 sps:$4 sm:$0xff]  }
  0x63   :  { %671 = vmatprep.subr.bf16.mxu1 %v3650_v31  ;;  %v3691_v8 = vld [vmem:[#allocation3 + $0x1c0] ss:$8 sps:$4 sm:$0xff]   ;;  %v3692_v9 = vld [vmem:[#allocation3 + $0x1b4] ss:$8 sps:$4 sm:$0xff]   ;;  %v3696_v10 = vld [vmem:[#allocation3 + $0x84] ss:$8 sps:$4 sm:$0xff]  }
  0x64   :  { %v3694_v11 = vld [vmem:[#allocation3 + $0x80] ss:$8 sps:$4 sm:$0xff]   ;;  %v3697_v12 = vld [vmem:[#allocation3 + $0x1b0] ss:$8 sps:$4 sm:$0xff]   ;;  %v3698_v13 = vld [vmem:[#allocation3 + $0x1a4] ss:$8 sps:$4 sm:$0xff]  }
  0x65   :  { %249 = vmatpush1.bf16.msra.mxu0 %v3605_v19  ;;  %v3700_v14 = vld [vmem:[#allocation3 + $0x1a0] ss:$8 sps:$4 sm:$0xff]   ;;  %v3701_v15 = vld [vmem:[#allocation3 + $0x194] ss:$8 sps:$4 sm:$0xff]   ;;  %v3703_v16 = vld [vmem:[#allocation3 + $0x190] ss:$8 sps:$4 sm:$0xff]  }
  0x66   :  { %250 = vmatprep.subr.bf16.mxu0 %v3606_v20  ;;  %672 = vmatpush1.bf16.msra.mxu1 %v3655_v34  ;;  %v3704_v17 = vld [vmem:[#allocation3 + $0x184] ss:$8 sps:$4 sm:$0xff]   ;;  %v3706_v18 = vld [vmem:[#allocation3 + $0x180] ss:$8 sps:$4 sm:$0xff]   ;;  %v3709_v19 = vld [vmem:[#allocation3 + $0x274] ss:$8 sps:$4 sm:$0xff]   ;;  %v136_v20 = vlaneseq }
  0x67   :  { %673 = vmatprep.subr.bf16.mxu1 %v3656_v49  ;;  %vm456_vm0 = vsmask.f32 7424 }
  0x68   :  { %v137_v21 = vshrl.u32 %v136_v20, 7 }
  0x69   :  { %251 = vmatpush1.bf16.msra.mxu0 %v3608_v23  ;;  %v134_v23 = vld [vmem:[#allocation11] sm:$0xff] }
  0x6a   :  { %878 = vmatprep.subr.bf16.mxu0 %v3613_v24  ;;  %674 = vmatpush1.bf16.msra.mxu1 %v3661_v52  ;;  %v4305_v22 = vsub.s32 0, %v137_v21  ;;  %v135_v24 = vld [vmem:[#allocation11 + $0x8] sm:$0xff]  ;;  %v4308_v26 = vsub.s32 1, %v137_v21  ;;  %v4310_v27 = vsub.s32 2, %v137_v21 }
  0x6b   :  { %675 = vmatprep.subr.bf16.mxu1 %v3662_v53 }
  0x6c   :  { %269 = vmatmul.mubr.bf16.vlgmr.msra.gmra.mxu0 %v3609_v25  ;;  %v139_v25 = vrot.slane %v134_v23, %v4305_v22  ;;  %v300_v31 = vrot.slane %v134_v23, %v4308_v26  ;;  %v316_v34 = vrot.slane %v134_v23, %v4310_v27 }
  0x6d   :  { %278 = vmatprep.mubr.bf16.mxu0 %v4175_v0  ;;  %879 = vmatpush1.bf16.msra.mxu0 %v3611_v28  ;;  %v3679_v0 = vld [vmem:[#allocation3 + $0x1e0] ss:$8 sps:$4 sm:$0xff]   ;;  %v143_v28 = vrot.slane %v135_v24, %v4305_v22 }
  0x6e   :  { %880 = vmatprep.subr.bf16.mxu0 %v3616_v29  ;;  %676 = vmatpush1.bf16.msra.mxu1 %v3667_v56 }
  0x6f   :  { %677 = vmatprep.subr.bf16.mxu1 %v3668_v57 }
  0x71   :  { %881 = vmatpush1.bf16.msra.mxu0 %v3614_v32 }
  0x72   :  { %882 = vmatprep.subr.bf16.mxu0 %v3619_v33  ;;  %678 = vmatpush2.bf16.msra.mxu1 %v3673_v60 }
  0x73   :  { %679 = vmatprep.subr.bf16.mxu1 %v3674_v61 }
  0x74   :  { %279 = vmatmul.mubr.bf16.gmra.mxu0 %v3610_v35 }
  0x75   :  { %883 = vmatpush1.bf16.msra.mxu0 %v3617_v36  ;;  %v304_v36 = vrot.slane %v135_v24, %v4308_v26 }
  0x76   :  { %884 = vmatprep.subr.bf16.mxu0 %v3624_v37  ;;  %680 = vmatpush2.bf16.msra.mxu1 %v3679_v0 }
  0x77   :  { %681 = vmatprep.subr.bf16.mxu1 %v3680_v1 }
  0x79   :  { %885 = vmatpush1.bf16.msra.mxu0 %v3622_v38 }
  0x7a   :  { %886 = vmatprep.subr.bf16.mxu0 %v3630_v39  ;;  %682 = vmatpush2.bf16.msra.mxu1 %v3685_v4 }
  0x7b   :  { %683 = vmatprep.subr.bf16.mxu1 %v3686_v5 }
  0x7d   :  { %887 = vmatpush1.bf16.msra.mxu0 %v3628_v40  ;;  %v320_v40 = vrot.slane %v135_v24, %v4310_v27 }
  0x7e   :  { %888 = vmatprep.subr.bf16.mxu0 %v3636_v41  ;;  %684 = vmatpush2.bf16.msra.mxu1 %v3691_v8 }
  0x7f   :  { %685 = vmatprep.subr.bf16.mxu1 %v3692_v9 }
  0x81   :  { %889 = vmatpush1.bf16.msra.mxu0 %v3634_v42 }
  0x82   :  { %890 = vmatprep.subr.bf16.mxu0 %v3642_v43  ;;  %686 = vmatpush2.bf16.msra.mxu1 %v3697_v12 }
  0x83   :  { %687 = vmatprep.subr.bf16.mxu1 %v3698_v13 }
  0x85   :  { %891 = vmatpush1.bf16.msra.mxu0 %v3640_v44 }
  0x86   :  { %892 = vmatprep.subr.bf16.mxu0 %v3648_v45  ;;  %688 = vmatpush2.bf16.msra.mxu1 %v3700_v14 }
  0x87   :  { %689 = vmatprep.subr.bf16.mxu1 %v3701_v15 }
  0x89   :  { %893 = vmatpush1.bf16.msra.mxu0 %v3646_v46 }
  0x8a   :  { %894 = vmatprep.subr.bf16.mxu0 %v3654_v47  ;;  %690 = vmatpush2.bf16.msra.mxu1 %v3703_v16 }
  0x8b   :  { %691 = vmatprep.subr.bf16.mxu1 %v3704_v17 }
  0x8d   :  { %895 = vmatpush2.bf16.msra.mxu0 %v3652_v48 }
  0x8e   :  { %896 = vmatprep.subr.bf16.mxu0 %v3660_v50  ;;  %692 = vmatpush2.bf16.msra.mxu1 %v3706_v18  ;;  %v401_v18 = vld [vmem:[#allocation2 + $0x18] sm:$0x11] }
  0x8f   :  { %1145 = vmatprep.subr.bf16.mxu1 %v3709_v19 }
  0x91   :  { %897 = vmatpush2.bf16.msra.mxu0 %v3658_v51 }
  0x92   :  { %898 = vmatprep.subr.bf16.mxu0 %v3666_v54 }
  0x95   :  { %899 = vmatpush2.bf16.msra.mxu0 %v3664_v55 }
  0x96   :  { %900 = vmatprep.subr.bf16.mxu0 %v3672_v58 }
  0x99   :  { %901 = vmatpush2.bf16.msra.mxu0 %v3670_v59 }
  0x9a   :  { %902 = vmatprep.subr.bf16.mxu0 %v3678_v62 }
  0x9d   :  { %903 = vmatpush2.bf16.msra.mxu0 %v3676_v63 }
  0x9e   :  { %904 = vmatprep.subr.bf16.mxu0 %v3684_v2 }
  0xa1   :  { %905 = vmatpush2.bf16.msra.mxu0 %v3682_v3 }
  0xa2   :  { %906 = vmatprep.subr.bf16.mxu0 %v3690_v6 }
  0xa5   :  { %907 = vmatpush2.bf16.msra.mxu0 %v3688_v7 }
  0xa6   :  { %908 = vmatprep.subr.bf16.mxu0 %v3696_v10 }
  0xa9   :  { %909 = vmatpush2.bf16.msra.mxu0 %v3694_v11 }
 0x12c   :  { %v270_v29 = vpop.f32.mrf.mxu0 }
 0x12d   :  { %v271_v30 = vadd.f32 %v270_v29, %v139_v25  ;;  %v3212_v29 = vcombine.low %v401_v18, %v401_v18 }
 0x12e   :  { %v272_v32 = vpop.f32.mrf.mxu0 }
 0x12f   :  { %v289_v33 = vmax.f32 %v271_v30, 0.0  ;;  %v273_v35 = vadd.f32 %v272_v32, %v143_v28 }
 0x130   :  { %v274_v37 = vpop.f32.mrf.mxu0 }
 0x131   :  { %v305_v38 = vmul.f32 %v300_v31, %v289_v33  ;;  %v290_v39 = vmax.f32 %v273_v35, 0.0  ;;  %v275_v41 = vadd.f32 %v274_v37, %v139_v25  ;;  %v977_v37 = vrot.slane %v3212_v29, 1 }
 0x132   :  { %v276_v42 = vpop.f32.mrf.mxu0 }
 0x133   :  { %v321_v43 = vadd.f32 %v316_v34, %v305_v38  ;;  %v306_v44 = vmul.f32 %v304_v36, %v290_v39  ;;  %v291_v45 = vmax.f32 %v275_v41, 0.0  ;;  %v277_v46 = vadd.f32 %v276_v42, %v143_v28 }
 0x134   :  { %v280_v47 = vpop.f32.mrf.mxu0 }
 0x135   :  { %v322_v48 = vadd.f32 %v320_v40, %v306_v44  ;;  %v307_v49 = vmul.f32 %v300_v31, %v291_v45  ;;  %v292_v50 = vmax.f32 %v277_v46, 0.0  ;;  %v329_v51 = vmax.f32 %v321_v43, 0.0 }
 0x136   :  { %v281_v52 = vadd.f32 %v280_v47, %v139_v25  ;;  %v282_v53 = vpop.f32.mrf.mxu0 }
 0x137   :  { %v330_v54 = vmax.f32 %v322_v48, 0.0  ;;  %v323_v55 = vadd.f32 %v316_v34, %v307_v49  ;;  %v308_v56 = vmul.f32 %v304_v36, %v292_v50  ;;  %v283_v57 = vadd.f32 %v282_v53, %v143_v28  ;;  %v3707_v49 = vld [vmem:[#allocation3 + $0x270] ss:$8 sps:$4 sm:$0xff]  }
 0x138   :  { %v293_v58 = vmax.f32 %v281_v52, 0.0  ;;  %v284_v59 = vpop.f32.mrf.mxu0 }
 0x139   :  { %v3524_v60 = vpack.c.bf16 %v330_v54, %v329_v51  ;;  %v324_v61 = vadd.f32 %v320_v40, %v308_v56  ;;  %v294_v62 = vmax.f32 %v283_v57, 0.0  ;;  %v331_v63 = vmax.f32 %v323_v55, 0.0  ;;  %v3713_v55 = vld [vmem:[#allocation3 + $0x264] ss:$8 sps:$4 sm:$0xff]  }
 0x13a   :  { %v285_v0 = vadd.f32 %v284_v59, %v139_v25  ;;  %v286_v1 = vpop.f32.mrf.mxu0  ;;  %v309_v3 = vmul.f32 %v300_v31, %v293_v58  ;;  %v485_v56 = vshll.u32 %v3212_v29, 16  ;;  %v3711_v58 = vld [vmem:[#allocation3 + $0x260] ss:$8 sps:$4 sm:$0xff]   ;;  %v3750_v29 = vld [vmem:[#allocation3 + $0x2a4] ss:$8 sps:$4 sm:$0xff]  }
 0x13b   :  { %361 = vst [vmem:[#allocation2 + $0x28] sm:$0xff] %v3524_v60  ;;  %v332_v2 = vmax.f32 %v324_v61, 0.0  ;;  %v310_v4 = vmul.f32 %v304_v36, %v294_v62  ;;  %v287_v5 = vadd.f32 %v286_v1, %v143_v28  ;;  %v4015_v13 = vpack.c.bf16 %v331_v63, %v329_v51  ;;  %v3716_v60 = vld [vmem:[#allocation3 + $0x254] ss:$8 sps:$4 sm:$0xff]   ;;  %v3714_v1 = vld [vmem:[#allocation3 + $0x250] ss:$8 sps:$4 sm:$0xff]  }
 0x13c   :  { %v295_v6 = vmax.f32 %v285_v0, 0.0  ;;  %v325_v11 = vadd.f32 %v316_v34, %v309_v3  ;;  %v4319_v28 = vcombine.high %v401_v18, %v401_v18  ;;  %v3720_v3 = vld [vmem:[#allocation3 + $0x244] ss:$8 sps:$4 sm:$0xff]   ;;  %v3736_v18 = vld [vmem:[#allocation3 + $0x2e0] ss:$8 sps:$4 sm:$0xff]  }
 0x13d   :  { %v4317_v7 = vpack.c.bf16 %v332_v2, %v331_v63  ;;  %v326_v8 = vadd.f32 %v320_v40, %v310_v4  ;;  %v296_v9 = vmax.f32 %v287_v5, 0.0  ;;  %v4016_v14 = vpack.c.bf16 %v332_v2, %v330_v54 }
 0x13e   :  { %v311_v10 = vmul.f32 %v300_v31, %v295_v6  ;;  %v333_v20 = vmax.f32 %v325_v11, 0.0  ;;  %v460_v24 = vshll.u32 %v4015_v13, 16  ;;  %v493_v31 = vshll.u32 %v4319_v28, 16  ;;  %v3718_v6 = vld [vmem:[#allocation3 + $0x240] ss:$8 sps:$4 sm:$0xff]  }
 0x13f   :  { %v312_v12 = vmul.f32 %v304_v36, %v296_v9  ;;  %v334_v16 = vmax.f32 %v326_v8, 0.0  ;;  %910 = vmatprep.mubr.bf16.mxu0 %v4016_v14  ;;  %v472_v19 = vshll.u32 %v4016_v14, 16  ;;  %v470_v36 = vshrl.u32 %v4016_v14, 16  ;;  %v3721_v8 = vld [vmem:[#allocation3 + $0x230] ss:$8 sps:$4 sm:$0xff]  }
 0x140   :  { %v327_v15 = vadd.f32 %v316_v34, %v311_v10  ;;  %911 = vmatmul.mubr.bf16.vlgmr.msra.gmra.mxu0 %v4015_v13  ;;  %v462_v35 = vrot.slane %v460_v24, 1  ;;  %v458_v39 = vshrl.u32 %v4015_v13, 16  ;;  %v495_v42 = vrot.slane %v493_v31, 1  ;;  %v3726_v9 = vld [vmem:[#allocation3 + $0x224] ss:$8 sps:$4 sm:$0xff]  }
 0x141   :  { %v328_v17 = vadd.f32 %v320_v40, %v312_v12  ;;  %v474_v30 = vrot.slane %v472_v19, 1  ;;  %v487_v63 = vrot.slane %v485_v56, 1  ;;  %v3724_v10 = vld [vmem:[#allocation3 + $0x220] ss:$8 sps:$4 sm:$0xff]   ;;  %v3729_v11 = vld [vmem:[#allocation3 + $0x214] ss:$8 sps:$4 sm:$0xff]  }
 0x142   :  { %v335_v21 = vmax.f32 %v327_v15, 0.0  ;;  %v931_v25 = vld [vmem:[#allocation2 + $0x28] sm:$0xee]  ;;  %v463_v46 = vor.u32 %v462_v35, %v458_v39  ;;  %v3732_v13 = vld [vmem:[#allocation3 + $0x204] ss:$8 sps:$4 sm:$0xff]  }
 0x143   :  { %v336_v23 = vmax.f32 %v328_v17, 0.0  ;;  %v3278_v32 = vcombine.low %v931_v25, %v4317_v7  ;;  %v475_v41 = vor.u32 %v474_v30, %v470_v36  ;;  %v3279_v61 = vcombine.high %v931_v25, %v4317_v7  ;;  %v3723_v7 = vld [vmem:[#allocation3 + $0x234] ss:$8 sps:$4 sm:$0xff]   ;;  %v3727_v12 = vld [vmem:[#allocation3 + $0x210] ss:$8 sps:$4 sm:$0xff]  }
 0x144   :  { %v4018_v34 = vpack.c.bf16 %v335_v21, %v333_v20  ;;  %v3730_v14 = vld [vmem:[#allocation3 + $0x200] ss:$8 sps:$4 sm:$0xff]   ;;  %v3735_v15 = vld [vmem:[#allocation3 + $0x2f4] ss:$8 sps:$4 sm:$0xff]   ;;  %v3738_v17 = vld [vmem:[#allocation3 + $0x2e4] ss:$8 sps:$4 sm:$0xff]  }
 0x145   :  { %v4323_v33 = vpack.c.bf16 %v336_v23, %v334_v16  ;;  %v971_v43 = vrot.slane %v3278_v32, 1  ;;  %v974_v2 = vrot.slane %v3279_v61, 1  ;;  %v3733_v16 = vld [vmem:[#allocation3 + $0x2f0] ss:$8 sps:$4 sm:$0xff]   ;;  %v3741_v19 = vld [vmem:[#allocation3 + $0x2d4] ss:$8 sps:$4 sm:$0xff]  }
 0x146   :  { %v465_v40 = vshll.u32 %v4018_v34, 16  ;;  %v972_v44 = vrot.slane %v4018_v34, 1  ;;  %v481_v59 = vshrl.u32 %v4018_v34, 16  ;;  %v3739_v20 = vld [vmem:[#allocation3 + $0x2d0] ss:$8 sps:$4 sm:$0xff]   ;;  %v979_v36 = vrot.slane %v4319_v28, 1 }
 0x147   :  { %920 = vmatprep.mubr.bf16.mxu0 %v4323_v33  ;;  %v477_v38 = vshll.u32 %v4323_v33, 16  ;;  %v489_v48 = vshrl.u32 %v4323_v33, 16  ;;  %v975_v0 = vrot.slane %v4323_v33, 1  ;;  %v3744_v21 = vld [vmem:[#allocation3 + $0x2c4] ss:$8 sps:$4 sm:$0xff]  }
 0x148   :  { %921 = vmatmul.mubr.bf16.gmra.mxu0 %v4018_v34  ;;  %v467_v47 = vrot.slane %v465_v40, 1  ;;  %v4329_v50 = vsel %vm970_vm1, %v971_v43, %v972_v44  ;;  %v4332_v51 = vsel %vm970_vm1, %v972_v44, %v977_v37  ;;  %v3742_v23 = vld [vmem:[#allocation3 + $0x2c0] ss:$8 sps:$4 sm:$0xff]   ;;  %v3747_v24 = vld [vmem:[#allocation3 + $0x2b4] ss:$8 sps:$4 sm:$0xff]  }
 0x149   :  { %v479_v45 = vrot.slane %v477_v38, 1  ;;  %v976_v5 = vsel %vm970_vm1, %v974_v2, %v975_v0  ;;  %v3745_v25 = vld [vmem:[#allocation3 + $0x2b0] ss:$8 sps:$4 sm:$0xff]   ;;  %v3748_v30 = vld [vmem:[#allocation3 + $0x2a0] ss:$8 sps:$4 sm:$0xff]   ;;  %v980_v37 = vsel %vm970_vm1, %v975_v0, %v979_v36 }
 0x14a   :  { %v468_v53 = vsel %vm456_vm0, %v463_v46, %v467_v47  ;;  %v483_v62 = vor.u32 %v481_v59, %v467_v47  ;;  %v3753_v31 = vld [vmem:[#allocation3 + $0x294] ss:$8 sps:$4 sm:$0xff]   ;;  %v3751_v32 = vld [vmem:[#allocation3 + $0x290] ss:$8 sps:$4 sm:$0xff]   ;;  %v3756_v34 = vld [vmem:[#allocation3 + $0x284] ss:$8 sps:$4 sm:$0xff]  }
 0x14b   :  { %v480_v52 = vsel %vm456_vm0, %v475_v41, %v479_v45  ;;  %v491_v54 = vor.u32 %v489_v48, %v479_v45  ;;  %v3754_v35 = vld [vmem:[#allocation3 + $0x280] ss:$8 sps:$4 sm:$0xff]   ;;  %v3757_v38 = vld [vmem:[#allocation5 + $0x70] ss:$8 sps:$4 sm:$0xff]   ;;  %v3759_v39 = vld [vmem:[#allocation5 + $0x74] ss:$8 sps:$4 sm:$0xff]  }
 0x14c   :  { %693 = vmatprep.mubr.bf16.mxu1 %v480_v52  ;;  %v488_v4 = vsel %vm456_vm0, %v483_v62, %v487_v63  ;;  %v3762_v40 = vld [vmem:[#allocation5 + $0x64] ss:$8 sps:$4 sm:$0xff]   ;;  %v3766_v41 = vld [vmem:[#allocation5 + $0x170] ss:$8 sps:$4 sm:$0xff]   ;;  %v3760_v43 = vld [vmem:[#allocation5 + $0x60] ss:$8 sps:$4 sm:$0xff]  }
 0x14d   :  { %694 = vmatmul.mubr.bf16.vlgmr.msra.gmra.mxu1 %v468_v53  ;;  %v496_v57 = vsel %vm456_vm0, %v491_v54, %v495_v42  ;;  %v3768_v42 = vld [vmem:[#allocation5 + $0x174] ss:$8 sps:$4 sm:$0xff]   ;;  %v3774_v44 = vld [vmem:[#allocation5 + $0x164] ss:$8 sps:$4 sm:$0xff]   ;;  %v3772_v45 = vld [vmem:[#allocation5 + $0x160] ss:$8 sps:$4 sm:$0xff]  }
 0x14e   :  { %1146 = vmatpush1.bf16.msra.mxu1 %v3707_v49  ;;  %703 = vmatprep.mubr.bf16.mxu1 %v496_v57  ;;  %v3765_v28 = vld [vmem:[#allocation5 + $0x54] ss:$8 sps:$4 sm:$0xff]   ;;  %v3763_v46 = vld [vmem:[#allocation5 + $0x50] ss:$8 sps:$4 sm:$0xff]   ;;  %v3771_v47 = vld [vmem:[#allocation5 + $0x44] ss:$8 sps:$4 sm:$0xff]  }
 0x14f   :  { %1147 = vmatprep.subr.bf16.mxu1 %v3713_v55  ;;  %1596 = vmatprep.subr.bf16.mxu0 %v3768_v42  ;;  %v3780_v33 = vld [vmem:[#allocation5 + $0x154] ss:$8 sps:$4 sm:$0xff]   ;;  %v3778_v48 = vld [vmem:[#allocation5 + $0x150] ss:$8 sps:$4 sm:$0xff]   ;;  %v3786_v49 = vld [vmem:[#allocation5 + $0x144] ss:$8 sps:$4 sm:$0xff]  }
 0x150   :  { %1597 = vmatpush1.bf16.msra.mxu0 %v3766_v41  ;;  %v3784_v52 = vld [vmem:[#allocation5 + $0x140] ss:$8 sps:$4 sm:$0xff]   ;;  %v3792_v53 = vld [vmem:[#allocation5 + $0x134] ss:$8 sps:$4 sm:$0xff]   ;;  %v3775_v54 = vld [vmem:[#allocation5 + $0x30] ss:$8 sps:$4 sm:$0xff]  }
 0x151   :  { %1598 = vmatprep.subr.bf16.mxu0 %v3774_v44  ;;  %v3783_v55 = vld [vmem:[#allocation5 + $0x24] ss:$8 sps:$4 sm:$0xff]   ;;  %v3790_v56 = vld [vmem:[#allocation5 + $0x130] ss:$8 sps:$4 sm:$0xff]   ;;  %v3781_v57 = vld [vmem:[#allocation5 + $0x20] ss:$8 sps:$4 sm:$0xff]  }
 0x152   :  { %1148 = vmatpush1.bf16.msra.mxu1 %v3711_v58  ;;  %v3789_v58 = vld [vmem:[#allocation5 + $0x14] ss:$8 sps:$4 sm:$0xff]   ;;  %v3787_v59 = vld [vmem:[#allocation5 + $0x10] ss:$8 sps:$4 sm:$0xff]   ;;  %v3793_v61 = vld [vmem:[#allocation5] ss:$8 sps:$4 sm:$0xff]  }
 0x153   :  { %1149 = vmatprep.subr.bf16.mxu1 %v3716_v60  ;;  %v3795_v60 = vld [vmem:[#allocation5 + $0x4] ss:$8 sps:$4 sm:$0xff]   ;;  %v3801_v63 = vld [vmem:[#allocation5 + $0xf4] ss:$8 sps:$4 sm:$0xff]   ;;  %v3796_v0 = vld [vmem:[#allocation5 + $0x120] ss:$8 sps:$4 sm:$0xff]  }
 0x154   :  { %1599 = vmatpush1.bf16.msra.mxu0 %v3772_v45  ;;  %v3798_v62 = vld [vmem:[#allocation5 + $0x124] ss:$8 sps:$4 sm:$0xff]   ;;  %v3804_v2 = vld [vmem:[#allocation5 + $0x114] ss:$8 sps:$4 sm:$0xff]   ;;  %v3844_v36 = vld [vmem:[#allocation5 + $0x1a0] ss:$8 sps:$4 sm:$0xff]  }
 0x155   :  { %704 = vmatmul.mubr.bf16.gmra.mxu1 %v488_v4  ;;  %1600 = vmatprep.subr.bf16.mxu0 %v3780_v33  ;;  %v3802_v4 = vld [vmem:[#allocation5 + $0x110] ss:$8 sps:$4 sm:$0xff]   ;;  %v3855_v41 = vld [vmem:[#allocation5 + $0x274] ss:$8 sps:$4 sm:$0xff]  }
 0x156   :  { %1150 = vmatpush1.bf16.msra.mxu1 %v3714_v1  ;;  %1177 = vmatprep.mubr.bf16.mxu1 %v976_v5  ;;  %v3799_v1 = vld [vmem:[#allocation5 + $0xf0] ss:$8 sps:$4 sm:$0xff]   ;;  %v3805_v5 = vld [vmem:[#allocation5 + $0xe0] ss:$8 sps:$4 sm:$0xff]  }
 0x157   :  { %1151 = vmatprep.subr.bf16.mxu1 %v3720_v3  ;;  %v3807_v3 = vld [vmem:[#allocation5 + $0xe4] ss:$8 sps:$4 sm:$0xff]  }
 0x158   :  { %1601 = vmatpush1.bf16.msra.mxu0 %v3778_v48 }
 0x159   :  { %1602 = vmatprep.subr.bf16.mxu0 %v3786_v49 }
 0x15a   :  { %1152 = vmatpush1.bf16.msra.mxu1 %v3718_v6  ;;  %v3810_v6 = vld [vmem:[#allocation5 + $0x104] ss:$8 sps:$4 sm:$0xff]  }
 0x15b   :  { %1153 = vmatprep.subr.bf16.mxu1 %v3723_v7  ;;  %v3813_v7 = vld [vmem:[#allocation5 + $0xd4] ss:$8 sps:$4 sm:$0xff]  }
 0x15c   :  { %1603 = vmatpush1.bf16.msra.mxu0 %v3784_v52 }
 0x15d   :  { %1604 = vmatprep.subr.bf16.mxu0 %v3792_v53  ;;  %v1208_v53 = vld [vmem:[#allocation11 + $0x18] sm:$0xff] }
 0x15e   :  { %1154 = vmatpush1.bf16.msra.mxu1 %v3721_v8  ;;  %v3808_v8 = vld [vmem:[#allocation5 + $0x100] ss:$8 sps:$4 sm:$0xff]  }
 0x15f   :  { %1155 = vmatprep.subr.bf16.mxu1 %v3726_v9  ;;  %v3811_v9 = vld [vmem:[#allocation5 + $0xd0] ss:$8 sps:$4 sm:$0xff]  }
 0x160   :  { %1605 = vmatpush1.bf16.msra.mxu0 %v3790_v56 }
 0x161   :  { %1606 = vmatprep.subr.bf16.mxu0 %v3798_v62 }
 0x162   :  { %1156 = vmatpush1.bf16.msra.mxu1 %v3724_v10  ;;  %v3816_v10 = vld [vmem:[#allocation5 + $0x1f4] ss:$8 sps:$4 sm:$0xff]  }
 0x163   :  { %1157 = vmatprep.subr.bf16.mxu1 %v3729_v11  ;;  %v3819_v11 = vld [vmem:[#allocation5 + $0xc4] ss:$8 sps:$4 sm:$0xff]  }
 0x164   :  { %1607 = vmatpush1.bf16.msra.mxu0 %v3796_v0 }
 0x165   :  { %1608 = vmatprep.subr.bf16.mxu0 %v3804_v2 }
 0x166   :  { %1158 = vmatpush1.bf16.msra.mxu1 %v3727_v12  ;;  %v3814_v12 = vld [vmem:[#allocation5 + $0x1f0] ss:$8 sps:$4 sm:$0xff]  }
 0x167   :  { %1159 = vmatprep.subr.bf16.mxu1 %v3732_v13  ;;  %v3817_v13 = vld [vmem:[#allocation5 + $0xc0] ss:$8 sps:$4 sm:$0xff]  }
 0x168   :  { %1609 = vmatpush1.bf16.msra.mxu0 %v3802_v4 }
 0x169   :  { %1610 = vmatprep.subr.bf16.mxu0 %v3810_v6 }
 0x16a   :  { %1160 = vmatpush1.bf16.msra.mxu1 %v3730_v14  ;;  %v3822_v14 = vld [vmem:[#allocation5 + $0x1e4] ss:$8 sps:$4 sm:$0xff]  }
 0x16b   :  { %1161 = vmatprep.subr.bf16.mxu1 %v3735_v15  ;;  %v3825_v15 = vld [vmem:[#allocation5 + $0xb4] ss:$8 sps:$4 sm:$0xff]  }
 0x16c   :  { %1611 = vmatpush1.bf16.msra.mxu0 %v3808_v8 }
 0x16d   :  { %1612 = vmatprep.subr.bf16.mxu0 %v3816_v10  ;;  %v1256_v10 = vrot.slane %v1208_v53, %v4310_v27 }
 0x16e   :  { %1162 = vmatpush2.bf16.msra.mxu1 %v3733_v16  ;;  %v3820_v16 = vld [vmem:[#allocation5 + $0x1e0] ss:$8 sps:$4 sm:$0xff]  }
 0x16f   :  { %1163 = vmatprep.subr.bf16.mxu1 %v3738_v17  ;;  %v3823_v17 = vld [vmem:[#allocation5 + $0xb0] ss:$8 sps:$4 sm:$0xff]  }
 0x170   :  { %1613 = vmatpush2.bf16.msra.mxu0 %v3814_v12 }
 0x171   :  { %1614 = vmatprep.subr.bf16.mxu0 %v3822_v14 }
 0x172   :  { %1164 = vmatpush2.bf16.msra.mxu1 %v3736_v18  ;;  %v3828_v18 = vld [vmem:[#allocation5 + $0x1d4] ss:$8 sps:$4 sm:$0xff]  }
 0x173   :  { %1165 = vmatprep.subr.bf16.mxu1 %v3741_v19  ;;  %v3831_v19 = vld [vmem:[#allocation5 + $0xa4] ss:$8 sps:$4 sm:$0xff]  }
 0x174   :  { %1615 = vmatpush2.bf16.msra.mxu0 %v3820_v16 }
 0x175   :  { %1616 = vmatprep.subr.bf16.mxu0 %v3828_v18 }
 0x176   :  { %1166 = vmatpush2.bf16.msra.mxu1 %v3739_v20  ;;  %v3826_v20 = vld [vmem:[#allocation5 + $0x1d0] ss:$8 sps:$4 sm:$0xff]  }
 0x177   :  { %1167 = vmatprep.subr.bf16.mxu1 %v3744_v21  ;;  %v3829_v21 = vld [vmem:[#allocation5 + $0xa0] ss:$8 sps:$4 sm:$0xff]  }
 0x178   :  { %1617 = vmatpush2.bf16.msra.mxu0 %v3826_v20 }
 0x17a   :  { %1168 = vmatpush2.bf16.msra.mxu1 %v3742_v23  ;;  %v3834_v23 = vld [vmem:[#allocation5 + $0x1c4] ss:$8 sps:$4 sm:$0xff]  }
 0x17b   :  { %1169 = vmatprep.subr.bf16.mxu1 %v3747_v24  ;;  %v3837_v24 = vld [vmem:[#allocation5 + $0x94] ss:$8 sps:$4 sm:$0xff]   ;;  %1618 = vmatprep.subr.bf16.mxu0 %v3834_v23 }
 0x17e   :  { %1170 = vmatpush2.bf16.msra.mxu1 %v3745_v25  ;;  %v3832_v25 = vld [vmem:[#allocation5 + $0x1c0] ss:$8 sps:$4 sm:$0xff]  }
 0x17f   :  { %1171 = vmatprep.subr.bf16.mxu1 %v3750_v29  ;;  %v3835_v29 = vld [vmem:[#allocation5 + $0x90] ss:$8 sps:$4 sm:$0xff]   ;;  %1619 = vmatpush2.bf16.msra.mxu0 %v3832_v25 }
 0x182   :  { %1172 = vmatpush2.bf16.msra.mxu1 %v3748_v30  ;;  %v3840_v30 = vld [vmem:[#allocation5 + $0x1b4] ss:$8 sps:$4 sm:$0xff]  }
 0x183   :  { %1173 = vmatprep.subr.bf16.mxu1 %v3753_v31  ;;  %v3843_v31 = vld [vmem:[#allocation5 + $0x84] ss:$8 sps:$4 sm:$0xff]   ;;  %1620 = vmatprep.subr.bf16.mxu0 %v3840_v30 }
 0x186   :  { %1174 = vmatpush2.bf16.msra.mxu1 %v3751_v32  ;;  %v3838_v32 = vld [vmem:[#allocation5 + $0x1b0] ss:$8 sps:$4 sm:$0xff]  }
 0x187   :  { %1175 = vmatprep.subr.bf16.mxu1 %v3756_v34  ;;  %v3841_v34 = vld [vmem:[#allocation5 + $0x80] ss:$8 sps:$4 sm:$0xff]   ;;  %1621 = vmatpush2.bf16.msra.mxu0 %v3838_v32 }
 0x18a   :  { %1176 = vmatpush2.bf16.msra.mxu1 %v3754_v35  ;;  %v3846_v35 = vld [vmem:[#allocation5 + $0x1a4] ss:$8 sps:$4 sm:$0xff]  }
 0x18b   :  { %1813 = vmatprep.subr.bf16.mxu1 %v3759_v39  ;;  %1622 = vmatprep.subr.bf16.mxu0 %v3846_v35  ;;  %v3852_v39 = vld [vmem:[#allocation5 + $0x184] ss:$8 sps:$4 sm:$0xff]  }
 0x18c   :  { %1623 = vmatpush2.bf16.msra.mxu0 %v3844_v36 }
 0x18d   :  { %1178 = vmatmul.mubr.bf16.vlgmr.msra.gmra.mxu1 %v4329_v50  ;;  %v3769_v50 = vld [vmem:[#allocation5 + $0x40] ss:$8 sps:$4 sm:$0xff]  }
 0x18e   :  { %1187 = vmatprep.mubr.bf16.mxu1 %v980_v37  ;;  %1814 = vmatpush1.bf16.msra.mxu1 %v3757_v38  ;;  %v3849_v37 = vld [vmem:[#allocation5 + $0x194] ss:$8 sps:$4 sm:$0xff]   ;;  %v3847_v38 = vld [vmem:[#allocation5 + $0x190] ss:$8 sps:$4 sm:$0xff]  }
 0x18f   :  { %1815 = vmatprep.subr.bf16.mxu1 %v3762_v40  ;;  %1624 = vmatprep.subr.bf16.mxu0 %v3849_v37  ;;  %v3850_v40 = vld [vmem:[#allocation5 + $0x180] ss:$8 sps:$4 sm:$0xff]  }
 0x190   :  { %1625 = vmatpush2.bf16.msra.mxu0 %v3847_v38 }
 0x191   :  { %1626 = vmatprep.subr.bf16.mxu0 %v3852_v39 }
 0x192   :  { %1816 = vmatpush1.bf16.msra.mxu1 %v3760_v43 }
 0x193   :  { %1817 = vmatprep.subr.bf16.mxu1 %v3765_v28 }
 0x194   :  { %1627 = vmatpush2.bf16.msra.mxu0 %v3850_v40 }
 0x195   :  { %1188 = vmatmul.mubr.bf16.gmra.mxu1 %v4332_v51  ;;  %v3777_v51 = vld [vmem:[#allocation5 + $0x34] ss:$8 sps:$4 sm:$0xff]   ;;  %2079 = vmatprep.subr.bf16.mxu0 %v3855_v41 }
 0x196   :  { %1818 = vmatpush1.bf16.msra.mxu1 %v3763_v46 }
 0x197   :  { %1819 = vmatprep.subr.bf16.mxu1 %v3771_v47 }
 0x19a   :  { %1820 = vmatpush1.bf16.msra.mxu1 %v3769_v50  ;;  %v1207_v50 = vld [vmem:[#allocation11 + $0x10] sm:$0xff] }
 0x19b   :  { %1821 = vmatprep.subr.bf16.mxu1 %v3777_v51  ;;  %v1236_v0 = vrot.slane %v1207_v50, %v4308_v26  ;;  %v1252_v2 = vrot.slane %v1207_v50, %v4310_v27 }
 0x19e   :  { %1822 = vmatpush1.bf16.msra.mxu1 %v3775_v54 }
 0x19f   :  { %1823 = vmatprep.subr.bf16.mxu1 %v3783_v55  ;;  %v1212_v55 = vrot.slane %v1207_v50, %v4305_v22 }
 0x1a2   :  { %1824 = vmatpush1.bf16.msra.mxu1 %v3781_v57 }
 0x1a3   :  { %1825 = vmatprep.subr.bf16.mxu1 %v3789_v58 }
 0x1a6   :  { %1826 = vmatpush1.bf16.msra.mxu1 %v3787_v59 }
 0x1a7   :  { %1827 = vmatprep.subr.bf16.mxu1 %v3795_v60  ;;  %v1216_v60 = vrot.slane %v1208_v53, %v4305_v22 }
 0x1aa   :  { %1828 = vmatpush1.bf16.msra.mxu1 %v3793_v61 }
 0x1ab   :  { %1829 = vmatprep.subr.bf16.mxu1 %v3801_v63 }
 0x1ae   :  { %1830 = vmatpush2.bf16.msra.mxu1 %v3799_v1 }
 0x1af   :  { %1831 = vmatprep.subr.bf16.mxu1 %v3807_v3  ;;  %v1240_v3 = vrot.slane %v1208_v53, %v4308_v26 }
 0x1b2   :  { %1832 = vmatpush2.bf16.msra.mxu1 %v3805_v5 }
 0x1b3   :  { %1833 = vmatprep.subr.bf16.mxu1 %v3813_v7 }
 0x1b6   :  { %1834 = vmatpush2.bf16.msra.mxu1 %v3811_v9 }
 0x1b7   :  { %1835 = vmatprep.subr.bf16.mxu1 %v3819_v11 }
 0x1ba   :  { %1836 = vmatpush2.bf16.msra.mxu1 %v3817_v13 }
 0x1bb   :  { %1837 = vmatprep.subr.bf16.mxu1 %v3825_v15 }
 0x1be   :  { %1838 = vmatpush2.bf16.msra.mxu1 %v3823_v17 }
 0x1bf   :  { %1839 = vmatprep.subr.bf16.mxu1 %v3831_v19 }
 0x1c2   :  { %1840 = vmatpush2.bf16.msra.mxu1 %v3829_v21 }
 0x1c3   :  { %1841 = vmatprep.subr.bf16.mxu1 %v3837_v24 }
 0x1c6   :  { %1842 = vmatpush2.bf16.msra.mxu1 %v3835_v29 }
 0x1c7   :  { %1843 = vmatprep.subr.bf16.mxu1 %v3843_v31 }
 0x1ca   :  { %1844 = vmatpush2.bf16.msra.mxu1 %v3841_v34 }
 0x200   :  { %v912_v45 = vpop.f32.mrf.mxu0 }
 0x202   :  { %v914_v46 = vpop.f32.mrf.mxu0 }
 0x204   :  { %v916_v48 = vpop.f32.mrf.mxu0 }
 0x206   :  { %v918_v51 = vpop.f32.mrf.mxu0 }
 0x208   :  { %v922_v57 = vpop.f32.mrf.mxu0 }
 0x20a   :  { %v924_v5 = vpop.f32.mrf.mxu0 }
 0x20c   :  { %v926_v18 = vpop.f32.mrf.mxu0 }
 0x20d   :  { %v695_v42 = vpop.f32.mrf.mxu1 }
 0x20e   :  { %v913_v54 = vadd.f32 %v912_v45, %v695_v42  ;;  %v928_v39 = vpop.f32.mrf.mxu0 }
 0x20f   :  { %v697_v43 = vpop.f32.mrf.mxu1 }
 0x210   :  { %v915_v58 = vadd.f32 %v914_v46, %v697_v43 }
 0x211   :  { %v699_v44 = vpop.f32.mrf.mxu1 }
 0x212   :  { %v917_v62 = vadd.f32 %v916_v48, %v699_v44 }
 0x213   :  { %v701_v28 = vpop.f32.mrf.mxu1 }
 0x214   :  { %v919_v6 = vadd.f32 %v918_v51, %v701_v28 }
 0x215   :  { %v705_v33 = vpop.f32.mrf.mxu1 }
 0x216   :  { %v923_v16 = vadd.f32 %v922_v57, %v705_v33 }
 0x217   :  { %v707_v47 = vpop.f32.mrf.mxu1 }
 0x218   :  { %v925_v24 = vadd.f32 %v924_v5, %v707_v47 }
 0x219   :  { %v709_v49 = vpop.f32.mrf.mxu1 }
 0x21a   :  { %v927_v30 = vadd.f32 %v926_v18, %v709_v49 }
 0x21b   :  { %v711_v52 = vpop.f32.mrf.mxu1 }
 0x21c   :  { %v929_v44 = vadd.f32 %v928_v39, %v711_v52 }
 0x24d   :  { %v1179_v56 = vpop.f32.mrf.mxu1 }
 0x24e   :  { %v1198_v59 = vadd.f32 %v1179_v56, %v913_v54 }
 0x24f   :  { %v1181_v61 = vpop.f32.mrf.mxu1 }
 0x250   :  { %v1217_v63 = vadd.f32 %v1212_v55, %v1198_v59  ;;  %v1199_v1 = vadd.f32 %v1181_v61, %v915_v58 }
 0x251   :  { %v1183_v4 = vpop.f32.mrf.mxu1 }
 0x252   :  { %v1225_v7 = vmax.f32 %v1217_v63, 0.0  ;;  %v1218_v8 = vadd.f32 %v1216_v60, %v1199_v1  ;;  %v1200_v9 = vadd.f32 %v1183_v4, %v917_v62 }
 0x253   :  { %v1185_v11 = vpop.f32.mrf.mxu1 }
 0x254   :  { %v1241_v12 = vmul.f32 %v1236_v0, %v1225_v7  ;;  %v1226_v13 = vmax.f32 %v1218_v8, 0.0  ;;  %v1219_v14 = vadd.f32 %v1212_v55, %v1200_v9  ;;  %v1201_v15 = vadd.f32 %v1185_v11, %v919_v6  ;;  %v1337_v8 = vld [vmem:[#allocation2 + $0x18] sm:$0x11] }
 0x255   :  { %v1189_v17 = vpop.f32.mrf.mxu1 }
 0x256   :  { %v1257_v19 = vadd.f32 %v1252_v2, %v1241_v12  ;;  %v1242_v20 = vmul.f32 %v1240_v3, %v1226_v13  ;;  %v1227_v21 = vmax.f32 %v1219_v14, 0.0  ;;  %v1220_v23 = vadd.f32 %v1216_v60, %v1201_v15 }
 0x257   :  { %v1202_v25 = vadd.f32 %v1189_v17, %v923_v16  ;;  %v1191_v29 = vpop.f32.mrf.mxu1  ;;  %v4357_v15 = vcombine.high %v1337_v8, %v1337_v8 }
 0x258   :  { %v1258_v31 = vadd.f32 %v1256_v10, %v1242_v20  ;;  %v1243_v32 = vmul.f32 %v1236_v0, %v1227_v21  ;;  %v1228_v34 = vmax.f32 %v1220_v23, 0.0  ;;  %v1265_v35 = vmax.f32 %v1257_v19, 0.0 }
 0x259   :  { %v1221_v36 = vadd.f32 %v1212_v55, %v1202_v25  ;;  %v1203_v37 = vadd.f32 %v1191_v29, %v925_v24  ;;  %v1193_v38 = vpop.f32.mrf.mxu1  ;;  %v1428_v17 = vshll.u32 %v4357_v15, 16 }
 0x25a   :  { %v1266_v40 = vmax.f32 %v1258_v31, 0.0  ;;  %v1259_v41 = vadd.f32 %v1252_v2, %v1243_v32  ;;  %v1244_v42 = vmul.f32 %v1240_v3, %v1228_v34  ;;  %v1204_v43 = vadd.f32 %v1193_v38, %v927_v30 }
 0x25b   :  { %v1229_v28 = vmax.f32 %v1221_v36, 0.0  ;;  %v1222_v45 = vadd.f32 %v1216_v60, %v1203_v37  ;;  %v1195_v33 = vpop.f32.mrf.mxu1  ;;  %v1430_v29 = vrot.slane %v1428_v17, 1  ;;  %v3853_v37 = vld [vmem:[#allocation5 + $0x270] ss:$8 sps:$4 sm:$0xff]   ;;  %v3899_v17 = vld [vmem:[#allocation5 + $0x294] ss:$8 sps:$4 sm:$0xff]  }
 0x25c   :  { %v3528_v46 = vpack.c.bf16 %v1266_v40, %v1265_v35  ;;  %v1260_v47 = vadd.f32 %v1256_v10, %v1244_v42  ;;  %v1223_v48 = vadd.f32 %v1212_v55, %v1204_v43  ;;  %v1205_v50 = vadd.f32 %v1195_v33, %v929_v44  ;;  %v3859_v43 = vld [vmem:[#allocation5 + $0x264] ss:$8 sps:$4 sm:$0xff]  }
 0x25d   :  { %v1230_v49 = vmax.f32 %v1222_v45, 0.0  ;;  %v1267_v51 = vmax.f32 %v1259_v41, 0.0  ;;  %v1245_v56 = vmul.f32 %v1236_v0, %v1229_v28  ;;  %v3857_v45 = vld [vmem:[#allocation5 + $0x260] ss:$8 sps:$4 sm:$0xff]  }
 0x25e   :  { %1297 = vst [vmem:[#allocation2 + $0x28] sm:$0xff] %v3528_v46  ;;  %v1268_v53 = vmax.f32 %v1260_v47, 0.0  ;;  %v1231_v54 = vmax.f32 %v1223_v48, 0.0  ;;  %v1224_v58 = vadd.f32 %v1216_v60, %v1205_v50  ;;  %v3862_v46 = vld [vmem:[#allocation5 + $0x254] ss:$8 sps:$4 sm:$0xff]  }
 0x25f   :  { %v1246_v57 = vmul.f32 %v1240_v3, %v1230_v49  ;;  %v4019_v63 = vpack.c.bf16 %v1267_v51, %v1265_v35  ;;  %v1261_v4 = vadd.f32 %v1252_v2, %v1245_v56 }
 0x260   :  { %v4355_v59 = vpack.c.bf16 %v1268_v53, %v1267_v51  ;;  %v1247_v61 = vmul.f32 %v1236_v0, %v1231_v54  ;;  %v1232_v52 = vmax.f32 %v1224_v58, 0.0  ;;  %v4020_v1 = vpack.c.bf16 %v1268_v53, %v1266_v40  ;;  %v3860_v51 = vld [vmem:[#allocation5 + $0x250] ss:$8 sps:$4 sm:$0xff]   ;;  %v3866_v54 = vld [vmem:[#allocation5 + $0x244] ss:$8 sps:$4 sm:$0xff]  }
 0x261   :  { %v1262_v62 = vadd.f32 %v1256_v10, %v1246_v57  ;;  %v1269_v11 = vmax.f32 %v1261_v4, 0.0  ;;  %v1395_v60 = vshll.u32 %v4019_v63, 16  ;;  %v3320_v0 = vcombine.low %v1337_v8, %v1337_v8  ;;  %v3864_v58 = vld [vmem:[#allocation5 + $0x240] ss:$8 sps:$4 sm:$0xff]   ;;  %v3878_v4 = vld [vmem:[#allocation5 + $0x204] ss:$8 sps:$4 sm:$0xff]  }
 0x262   :  { %v1263_v5 = vadd.f32 %v1252_v2, %v1247_v61  ;;  %v1248_v6 = vmul.f32 %v1240_v3, %v1232_v52  ;;  %1845 = vmatprep.mubr.bf16.mxu1 %v4020_v1  ;;  %v1407_v9 = vshll.u32 %v4020_v1, 16  ;;  %v1405_v19 = vshrl.u32 %v4020_v1, 16  ;;  %v3867_v61 = vld [vmem:[#allocation5 + $0x230] ss:$8 sps:$4 sm:$0xff]   ;;  %v3870_v52 = vld [vmem:[#allocation5 + $0x220] ss:$8 sps:$4 sm:$0xff]  }
 0x263   :  { %v1270_v55 = vmax.f32 %v1262_v62, 0.0  ;;  %1846 = vmatmul.mubr.bf16.vlgmr.msra.gmra.mxu1 %v4019_v63  ;;  %v1911_v20 = vrot.slane %v3320_v0, 1  ;;  %v1393_v23 = vshrl.u32 %v4019_v63, 16  ;;  %v1420_v44 = vshll.u32 %v3320_v0, 16  ;;  %v3872_v62 = vld [vmem:[#allocation5 + $0x224] ss:$8 sps:$4 sm:$0xff]  }
 0x264   :  { %v1264_v7 = vadd.f32 %v1256_v10, %v1248_v6  ;;  %v1271_v12 = vmax.f32 %v1263_v5, 0.0  ;;  %v1409_v16 = vrot.slane %v1407_v9, 1  ;;  %v1397_v10 = vrot.slane %v1395_v60, 1  ;;  %v3875_v63 = vld [vmem:[#allocation5 + $0x214] ss:$8 sps:$4 sm:$0xff]  }
 0x265   :  { %v1866_v14 = vld [vmem:[#allocation2 + $0x28] sm:$0xee]  ;;  %v1422_v49 = vrot.slane %v1420_v44, 1  ;;  %v3876_v5 = vld [vmem:[#allocation5 + $0x200] ss:$8 sps:$4 sm:$0xff]  }
 0x266   :  { %v1272_v13 = vmax.f32 %v1264_v7, 0.0  ;;  %v3386_v2 = vcombine.low %v1866_v14, %v4355_v59  ;;  %v4022_v18 = vpack.c.bf16 %v1271_v12, %v1269_v11  ;;  %v1410_v25 = vor.u32 %v1409_v16, %v1405_v19  ;;  %v3873_v1 = vld [vmem:[#allocation5 + $0x210] ss:$8 sps:$4 sm:$0xff]   ;;  %v3881_v6 = vld [vmem:[#allocation5 + $0x2f4] ss:$8 sps:$4 sm:$0xff]  }
 0x267   :  { %v1398_v34 = vor.u32 %v1397_v10, %v1393_v23  ;;  %v3387_v47 = vcombine.high %v1866_v14, %v4355_v59  ;;  %v3869_v59 = vld [vmem:[#allocation5 + $0x234] ss:$8 sps:$4 sm:$0xff]   ;;  %v3884_v7 = vld [vmem:[#allocation5 + $0x2e4] ss:$8 sps:$4 sm:$0xff]   ;;  %v3882_v8 = vld [vmem:[#allocation5 + $0x2e0] ss:$8 sps:$4 sm:$0xff]  }
 0x268   :  { %v4361_v3 = vpack.c.bf16 %v1272_v13, %v1270_v55  ;;  %v1400_v24 = vshll.u32 %v4022_v18, 16  ;;  %v1905_v30 = vrot.slane %v3386_v2, 1  ;;  %v1906_v31 = vrot.slane %v4022_v18, 1  ;;  %v3879_v55 = vld [vmem:[#allocation5 + $0x2f0] ss:$8 sps:$4 sm:$0xff]  }
 0x269   :  { %v1416_v33 = vshrl.u32 %v4022_v18, 16  ;;  %v1908_v53 = vrot.slane %v3387_v47, 1  ;;  %v3887_v9 = vld [vmem:[#allocation5 + $0x2d4] ss:$8 sps:$4 sm:$0xff]   ;;  %v3885_v11 = vld [vmem:[#allocation5 + $0x2d0] ss:$8 sps:$4 sm:$0xff]  }
 0x26a   :  { %1855 = vmatprep.mubr.bf16.mxu1 %v4361_v3  ;;  %v1412_v21 = vshll.u32 %v4361_v3, 16  ;;  %v1402_v35 = vrot.slane %v1400_v24, 1  ;;  %v1424_v36 = vshrl.u32 %v4361_v3, 16  ;;  %v4367_v38 = vsel %vm970_vm1, %v1905_v30, %v1906_v31  ;;  %v3890_v12 = vld [vmem:[#allocation5 + $0x2c4] ss:$8 sps:$4 sm:$0xff]  }
 0x26b   :  { %1856 = vmatmul.mubr.bf16.gmra.mxu1 %v4022_v18  ;;  %v4370_v39 = vsel %vm970_vm1, %v1906_v31, %v1911_v20  ;;  %v1909_v50 = vrot.slane %v4361_v3, 1  ;;  %v3888_v13 = vld [vmem:[#allocation5 + $0x2c0] ss:$8 sps:$4 sm:$0xff]   ;;  %v3893_v60 = vld [vmem:[#allocation5 + $0x2b4] ss:$8 sps:$4 sm:$0xff]   ;;  %v1913_v19 = vrot.slane %v4357_v15, 1 }
 0x26c   :  { %v1414_v32 = vrot.slane %v1412_v21, 1  ;;  %v1403_v41 = vsel %vm456_vm0, %v1398_v34, %v1402_v35  ;;  %v1418_v48 = vor.u32 %v1416_v33, %v1402_v35  ;;  %v3891_v14 = vld [vmem:[#allocation5 + $0x2b0] ss:$8 sps:$4 sm:$0xff]   ;;  %v3896_v0 = vld [vmem:[#allocation5 + $0x2a4] ss:$8 sps:$4 sm:$0xff]  }
 0x26d   :  { %v1910_v57 = vsel %vm970_vm1, %v1908_v53, %v1909_v50  ;;  %v3894_v16 = vld [vmem:[#allocation5 + $0x2a0] ss:$8 sps:$4 sm:$0xff]   ;;  %v3897_v2 = vld [vmem:[#allocation5 + $0x290] ss:$8 sps:$4 sm:$0xff]   ;;  %v3902_v18 = vld [vmem:[#allocation5 + $0x284] ss:$8 sps:$4 sm:$0xff]   ;;  %v1914_v20 = vsel %vm970_vm1, %v1909_v50, %v1913_v19 }
 0x26e   :  { %v1415_v40 = vsel %vm456_vm0, %v1410_v25, %v1414_v32  ;;  %v1426_v42 = vor.u32 %v1424_v36, %v1414_v32  ;;  %v1423_v56 = vsel %vm456_vm0, %v1418_v48, %v1422_v49  ;;  %v3900_v10 = vld [vmem:[#allocation5 + $0x280] ss:$8 sps:$4 sm:$0xff]   ;;  %v3903_v21 = vld [vmem:[#allocation7 + $0x70] ss:$8 sps:$4 sm:$0xff]   ;;  %v3905_v23 = vld [vmem:[#allocation7 + $0x74] ss:$8 sps:$4 sm:$0xff]  }
 0x26f   :  { %1628 = vmatprep.mubr.bf16.mxu0 %v1415_v40  ;;  %v3908_v24 = vld [vmem:[#allocation7 + $0x64] ss:$8 sps:$4 sm:$0xff]   ;;  %2462 = vmatprep.subr.bf16.mxu1 %v3905_v23  ;;  %v3906_v25 = vld [vmem:[#allocation7 + $0x60] ss:$8 sps:$4 sm:$0xff]   ;;  %v3909_v15 = vld [vmem:[#allocation7 + $0x50] ss:$8 sps:$4 sm:$0xff]  }
 0x270   :  { %1629 = vmatmul.mubr.bf16.vlgmr.msra.gmra.mxu0 %v1403_v41  ;;  %v1431_v28 = vsel %vm456_vm0, %v1426_v42, %v1430_v29  ;;  %2463 = vmatpush1.bf16.msra.mxu1 %v3903_v21  ;;  %v3911_v29 = vld [vmem:[#allocation7 + $0x54] ss:$8 sps:$4 sm:$0xff]   ;;  %v3914_v30 = vld [vmem:[#allocation7 + $0x44] ss:$8 sps:$4 sm:$0xff]   ;;  %v3912_v31 = vld [vmem:[#allocation7 + $0x40] ss:$8 sps:$4 sm:$0xff]  }
 0x271   :  { %2080 = vmatpush1.bf16.msra.mxu0 %v3853_v37  ;;  %1638 = vmatprep.mubr.bf16.mxu0 %v1431_v28  ;;  %v3917_v3 = vld [vmem:[#allocation7 + $0x34] ss:$8 sps:$4 sm:$0xff]   ;;  %v3915_v32 = vld [vmem:[#allocation7 + $0x30] ss:$8 sps:$4 sm:$0xff]   ;;  %v3920_v34 = vld [vmem:[#allocation7 + $0x24] ss:$8 sps:$4 sm:$0xff]  }
 0x272   :  { %2081 = vmatprep.subr.bf16.mxu0 %v3859_v43  ;;  %2464 = vmatprep.subr.bf16.mxu1 %v3908_v24  ;;  %v3918_v35 = vld [vmem:[#allocation7 + $0x20] ss:$8 sps:$4 sm:$0xff]   ;;  %v3923_v36 = vld [vmem:[#allocation7 + $0x14] ss:$8 sps:$4 sm:$0xff]   ;;  %v3921_v37 = vld [vmem:[#allocation7 + $0x10] ss:$8 sps:$4 sm:$0xff]  }
 0x273   :  { %v3929_v40 = vld [vmem:[#allocation7 + $0xf4] ss:$8 sps:$4 sm:$0xff]   ;;  %v3927_v41 = vld [vmem:[#allocation7 + $0xf0] ss:$8 sps:$4 sm:$0xff]   ;;  %v3932_v42 = vld [vmem:[#allocation7 + $0xe4] ss:$8 sps:$4 sm:$0xff]  }
 0x274   :  { %2465 = vmatpush1.bf16.msra.mxu1 %v3906_v25  ;;  %v3930_v43 = vld [vmem:[#allocation7 + $0xe0] ss:$8 sps:$4 sm:$0xff]   ;;  %v3935_v44 = vld [vmem:[#allocation7 + $0xd4] ss:$8 sps:$4 sm:$0xff]   ;;  %v3933_v28 = vld [vmem:[#allocation7 + $0xd0] ss:$8 sps:$4 sm:$0xff]  }
 0x275   :  { %2082 = vmatpush1.bf16.msra.mxu0 %v3857_v45  ;;  %2466 = vmatprep.subr.bf16.mxu1 %v3911_v29  ;;  %v3938_v45 = vld [vmem:[#allocation7 + $0xc4] ss:$8 sps:$4 sm:$0xff]   ;;  %v3936_v33 = vld [vmem:[#allocation7 + $0xc0] ss:$8 sps:$4 sm:$0xff]   ;;  %v3939_v47 = vld [vmem:[#allocation7 + $0xb0] ss:$8 sps:$4 sm:$0xff]  }
 0x276   :  { %2083 = vmatprep.subr.bf16.mxu0 %v3862_v46  ;;  %v3941_v46 = vld [vmem:[#allocation7 + $0xb4] ss:$8 sps:$4 sm:$0xff]   ;;  %v3944_v48 = vld [vmem:[#allocation7 + $0xa4] ss:$8 sps:$4 sm:$0xff]   ;;  %v3942_v49 = vld [vmem:[#allocation7 + $0xa0] ss:$8 sps:$4 sm:$0xff]  }
 0x277   :  { %v3947_v50 = vld [vmem:[#allocation7 + $0x94] ss:$8 sps:$4 sm:$0xff]   ;;  %v3950_v53 = vld [vmem:[#allocation7 + $0x84] ss:$8 sps:$4 sm:$0xff]  }
 0x278   :  { %1639 = vmatmul.mubr.bf16.gmra.mxu0 %v1423_v56  ;;  %2467 = vmatpush1.bf16.msra.mxu1 %v3909_v15  ;;  %v3951_v56 = vld [vmem:[#allocation8 + $0x70] ss:$8 sps:$4 sm:$0xff]   ;;  %v2142_v24 = vld [vmem:[#allocation11 + $0x28] sm:$0xff] }
 0x279   :  { %2084 = vmatpush1.bf16.msra.mxu0 %v3860_v51  ;;  %2111 = vmatprep.mubr.bf16.mxu0 %v1910_v57  ;;  %v3945_v51 = vld [vmem:[#allocation7 + $0x90] ss:$8 sps:$4 sm:$0xff]   ;;  %v3953_v57 = vld [vmem:[#allocation8 + $0x74] ss:$8 sps:$4 sm:$0xff]  }
 0x27a   :  { %2085 = vmatprep.subr.bf16.mxu0 %v3866_v54  ;;  %2468 = vmatprep.subr.bf16.mxu1 %v3914_v30  ;;  %v3948_v54 = vld [vmem:[#allocation7 + $0x80] ss:$8 sps:$4 sm:$0xff]  }
 0x27c   :  { %2469 = vmatpush1.bf16.msra.mxu1 %v3912_v31 }
 0x27d   :  { %2086 = vmatpush1.bf16.msra.mxu0 %v3864_v58  ;;  %2470 = vmatprep.subr.bf16.mxu1 %v3917_v3  ;;  %v3956_v58 = vld [vmem:[#allocation8 + $0x64] ss:$8 sps:$4 sm:$0xff]  }
 0x27e   :  { %2087 = vmatprep.subr.bf16.mxu0 %v3869_v59  ;;  %v3954_v59 = vld [vmem:[#allocation8 + $0x60] ss:$8 sps:$4 sm:$0xff]  }
 0x280   :  { %2471 = vmatpush1.bf16.msra.mxu1 %v3915_v32  ;;  %v2150_v32 = vrot.slane %v2142_v24, %v4305_v22 }
 0x281   :  { %2088 = vmatpush1.bf16.msra.mxu0 %v3867_v61  ;;  %2472 = vmatprep.subr.bf16.mxu1 %v3920_v34  ;;  %v3959_v61 = vld [vmem:[#allocation8 + $0x54] ss:$8 sps:$4 sm:$0xff]  }
 0x282   :  { %2089 = vmatprep.subr.bf16.mxu0 %v3872_v62  ;;  %v3957_v62 = vld [vmem:[#allocation8 + $0x50] ss:$8 sps:$4 sm:$0xff]  }
 0x284   :  { %2473 = vmatpush1.bf16.msra.mxu1 %v3918_v35 }
 0x285   :  { %2090 = vmatpush1.bf16.msra.mxu0 %v3870_v52  ;;  %2474 = vmatprep.subr.bf16.mxu1 %v3923_v36  ;;  %v3962_v52 = vld [vmem:[#allocation8 + $0x44] ss:$8 sps:$4 sm:$0xff]  }
 0x286   :  { %2091 = vmatprep.subr.bf16.mxu0 %v3875_v63  ;;  %v3960_v63 = vld [vmem:[#allocation8 + $0x40] ss:$8 sps:$4 sm:$0xff]  }
 0x288   :  { %2475 = vmatpush1.bf16.msra.mxu1 %v3921_v37 }
 0x289   :  { %2092 = vmatpush1.bf16.msra.mxu0 %v3873_v1  ;;  %v3965_v1 = vld [vmem:[#allocation8 + $0x34] ss:$8 sps:$4 sm:$0xff]  }
 0x28a   :  { %2093 = vmatprep.subr.bf16.mxu0 %v3878_v4  ;;  %v3963_v4 = vld [vmem:[#allocation8 + $0x30] ss:$8 sps:$4 sm:$0xff]  }
 0x28d   :  { %2094 = vmatpush1.bf16.msra.mxu0 %v3876_v5  ;;  %v3968_v5 = vld [vmem:[#allocation8 + $0x24] ss:$8 sps:$4 sm:$0xff]  }
 0x28e   :  { %2095 = vmatprep.subr.bf16.mxu0 %v3881_v6  ;;  %v3966_v6 = vld [vmem:[#allocation8 + $0x20] ss:$8 sps:$4 sm:$0xff]  }
 0x291   :  { %2096 = vmatpush2.bf16.msra.mxu0 %v3879_v55  ;;  %v3971_v55 = vld [vmem:[#allocation8 + $0x14] ss:$8 sps:$4 sm:$0xff]  }
 0x292   :  { %2097 = vmatprep.subr.bf16.mxu0 %v3884_v7  ;;  %v3969_v7 = vld [vmem:[#allocation8 + $0x10] ss:$8 sps:$4 sm:$0xff]  }
 0x295   :  { %2098 = vmatpush2.bf16.msra.mxu0 %v3882_v8  ;;  %v3974_v8 = vld [vmem:[#allocation8 + $0x4] ss:$8 sps:$4 sm:$0xff]  }
 0x296   :  { %2099 = vmatprep.subr.bf16.mxu0 %v3887_v9  ;;  %v3972_v9 = vld [vmem:[#allocation8] ss:$8 sps:$4 sm:$0xff]  }
 0x299   :  { %2100 = vmatpush2.bf16.msra.mxu0 %v3885_v11  ;;  %v3977_v11 = vld [vmem:[#allocation8 + $0xf4] ss:$8 sps:$4 sm:$0xff]  }
 0x29a   :  { %2101 = vmatprep.subr.bf16.mxu0 %v3890_v12  ;;  %v3975_v12 = vld [vmem:[#allocation8 + $0xf0] ss:$8 sps:$4 sm:$0xff]  }
 0x29d   :  { %2102 = vmatpush2.bf16.msra.mxu0 %v3888_v13 }
 0x29e   :  { %2103 = vmatprep.subr.bf16.mxu0 %v3893_v60 }
 0x2a1   :  { %2104 = vmatpush2.bf16.msra.mxu0 %v3891_v14 }
 0x2a2   :  { %2105 = vmatprep.subr.bf16.mxu0 %v3896_v0 }
 0x2a5   :  { %2106 = vmatpush2.bf16.msra.mxu0 %v3894_v16 }
 0x2a6   :  { %2107 = vmatprep.subr.bf16.mxu0 %v3899_v17 }
 0x2a9   :  { %2108 = vmatpush2.bf16.msra.mxu0 %v3897_v2 }
 0x2aa   :  { %2109 = vmatprep.subr.bf16.mxu0 %v3902_v18 }
 0x2ad   :  { %2110 = vmatpush2.bf16.msra.mxu0 %v3900_v10 }
 0x2ae   :  { %2818 = vmatprep.subr.bf16.mxu0 %v3953_v57 }
 0x2b0   :  { %2112 = vmatmul.mubr.bf16.vlgmr.msra.gmra.mxu0 %v4367_v38  ;;  %v3926_v38 = vld [vmem:[#allocation7 + $0x4] ss:$8 sps:$4 sm:$0xff]  }
 0x2b1   :  { %2121 = vmatprep.mubr.bf16.mxu0 %v1914_v20  ;;  %2476 = vmatprep.subr.bf16.mxu1 %v3926_v38  ;;  %v2141_v20 = vld [vmem:[#allocation11 + $0x20] sm:$0xff] }
 0x2b2   :  { %2819 = vmatpush1.bf16.msra.mxu0 %v3951_v56  ;;  %v2146_v29 = vrot.slane %v2141_v20, %v4305_v22  ;;  %v2170_v38 = vrot.slane %v2141_v20, %v4308_v26 }
 0x2b3   :  { %2820 = vmatprep.subr.bf16.mxu0 %v3956_v58 }
 0x2b6   :  { %2821 = vmatpush1.bf16.msra.mxu0 %v3954_v59 }
 0x2b7   :  { %2822 = vmatprep.subr.bf16.mxu0 %v3959_v61 }
 0x2b8   :  { %2122 = vmatmul.mubr.bf16.gmra.mxu0 %v4370_v39  ;;  %v3924_v39 = vld [vmem:[#allocation7] ss:$8 sps:$4 sm:$0xff]  }
 0x2b9   :  { %2477 = vmatpush1.bf16.msra.mxu1 %v3924_v39  ;;  %v2174_v39 = vrot.slane %v2142_v24, %v4308_v26 }
 0x2ba   :  { %2478 = vmatprep.subr.bf16.mxu1 %v3929_v40  ;;  %2823 = vmatpush1.bf16.msra.mxu0 %v3957_v62 }
 0x2bb   :  { %2824 = vmatprep.subr.bf16.mxu0 %v3962_v52 }
 0x2bd   :  { %2479 = vmatpush2.bf16.msra.mxu1 %v3927_v41 }
 0x2be   :  { %2480 = vmatprep.subr.bf16.mxu1 %v3932_v42  ;;  %2825 = vmatpush1.bf16.msra.mxu0 %v3960_v63 }
 0x2bf   :  { %2826 = vmatprep.subr.bf16.mxu0 %v3965_v1 }
 0x2c1   :  { %2481 = vmatpush2.bf16.msra.mxu1 %v3930_v43 }
 0x2c2   :  { %2482 = vmatprep.subr.bf16.mxu1 %v3935_v44  ;;  %2827 = vmatpush1.bf16.msra.mxu0 %v3963_v4 }
 0x2c3   :  { %2828 = vmatprep.subr.bf16.mxu0 %v3968_v5 }
 0x2c5   :  { %2483 = vmatpush2.bf16.msra.mxu1 %v3933_v28 }
 0x2c6   :  { %2484 = vmatprep.subr.bf16.mxu1 %v3938_v45  ;;  %2829 = vmatpush1.bf16.msra.mxu0 %v3966_v6 }
 0x2c7   :  { %2830 = vmatprep.subr.bf16.mxu0 %v3971_v55 }
 0x2c9   :  { %2485 = vmatpush2.bf16.msra.mxu1 %v3936_v33 }
 0x2ca   :  { %2486 = vmatprep.subr.bf16.mxu1 %v3941_v46  ;;  %2831 = vmatpush1.bf16.msra.mxu0 %v3969_v7  ;;  %v2190_v46 = vrot.slane %v2142_v24, %v4310_v27 }
 0x2cb   :  { %2832 = vmatprep.subr.bf16.mxu0 %v3974_v8 }
 0x2cd   :  { %2487 = vmatpush2.bf16.msra.mxu1 %v3939_v47 }
 0x2ce   :  { %2488 = vmatprep.subr.bf16.mxu1 %v3944_v48  ;;  %2833 = vmatpush1.bf16.msra.mxu0 %v3972_v9 }
 0x2cf   :  { %2834 = vmatprep.subr.bf16.mxu0 %v3977_v11 }
 0x2d1   :  { %2489 = vmatpush2.bf16.msra.mxu1 %v3942_v49 }
 0x2d2   :  { %2490 = vmatprep.subr.bf16.mxu1 %v3947_v50  ;;  %2835 = vmatpush2.bf16.msra.mxu0 %v3975_v12  ;;  %v2186_v50 = vrot.slane %v2141_v20, %v4310_v27 }
 0x2d5   :  { %2491 = vmatpush2.bf16.msra.mxu1 %v3945_v51 }
 0x2d6   :  { %2492 = vmatprep.subr.bf16.mxu1 %v3950_v53 }
 0x2d9   :  { %2493 = vmatpush2.bf16.msra.mxu1 %v3948_v54 }
 0x323   :  { %v1847_v16 = vpop.f32.mrf.mxu1 }
 0x325   :  { %v1849_v2 = vpop.f32.mrf.mxu1 }
 0x327   :  { %v1851_v10 = vpop.f32.mrf.mxu1 }
 0x329   :  { %v1853_v21 = vpop.f32.mrf.mxu1 }
 0x32b   :  { %v1857_v30 = vpop.f32.mrf.mxu1 }
 0x32d   :  { %v1859_v41 = vpop.f32.mrf.mxu1 }
 0x32f   :  { %v1861_v53 = vpop.f32.mrf.mxu1 }
 0x330   :  { %v1630_v13 = vpop.f32.mrf.mxu0 }
 0x331   :  { %v1848_v25 = vadd.f32 %v1847_v16, %v1630_v13  ;;  %v1863_v7 = vpop.f32.mrf.mxu1 }
 0x332   :  { %v1632_v60 = vpop.f32.mrf.mxu0 }
 0x333   :  { %v1850_v31 = vadd.f32 %v1849_v2, %v1632_v60 }
 0x334   :  { %v1634_v14 = vpop.f32.mrf.mxu0 }
 0x335   :  { %v1852_v35 = vadd.f32 %v1851_v10, %v1634_v14 }
 0x336   :  { %v1636_v0 = vpop.f32.mrf.mxu0 }
 0x337   :  { %v1854_v42 = vadd.f32 %v1853_v21, %v1636_v0 }
 0x338   :  { %v1640_v17 = vpop.f32.mrf.mxu0 }
 0x339   :  { %v1858_v49 = vadd.f32 %v1857_v30, %v1640_v17 }
 0x33a   :  { %v1642_v18 = vpop.f32.mrf.mxu0 }
 0x33b   :  { %v1860_v59 = vadd.f32 %v1859_v41, %v1642_v18 }
 0x33c   :  { %v1644_v19 = vpop.f32.mrf.mxu0 }
 0x33d   :  { %v1862_v52 = vadd.f32 %v1861_v53, %v1644_v19  ;;  %v3995_v53 = vld [vmem:[#allocation8 + $0x94] ss:$8 sps:$4 sm:$0xff]  }
 0x33e   :  { %v1646_v23 = vpop.f32.mrf.mxu0 }
 0x33f   :  { %v1864_v13 = vadd.f32 %v1863_v7, %v1646_v23 }
 0x370   :  { %v2113_v15 = vpop.f32.mrf.mxu0 }
 0x371   :  { %v2132_v3 = vadd.f32 %v2113_v15, %v1848_v25 }
 0x372   :  { %v2115_v34 = vpop.f32.mrf.mxu0 }
 0x373   :  { %v2151_v36 = vadd.f32 %v2146_v29, %v2132_v3  ;;  %v2133_v37 = vadd.f32 %v2115_v34, %v1850_v31 }
 0x374   :  { %v2117_v40 = vpop.f32.mrf.mxu0 }
 0x375   :  { %v2159_v43 = vmax.f32 %v2151_v36, 0.0  ;;  %v2152_v44 = vadd.f32 %v2150_v32, %v2133_v37  ;;  %v2134_v28 = vadd.f32 %v2117_v40, %v1852_v35 }
 0x376   :  { %v2119_v45 = vpop.f32.mrf.mxu0 }
 0x377   :  { %v2160_v33 = vmax.f32 %v2152_v44, 0.0  ;;  %v2153_v47 = vadd.f32 %v2146_v29, %v2134_v28  ;;  %v2135_v48 = vadd.f32 %v2119_v45, %v1854_v42  ;;  %v2175_v54 = vmul.f32 %v2170_v38, %v2159_v43 }
 0x378   :  { %v2123_v51 = vpop.f32.mrf.mxu0 }
 0x379   :  { %v2176_v56 = vmul.f32 %v2174_v39, %v2160_v33  ;;  %v2161_v57 = vmax.f32 %v2153_v47, 0.0  ;;  %v2154_v58 = vadd.f32 %v2150_v32, %v2135_v48  ;;  %v2136_v61 = vadd.f32 %v2123_v51, %v1858_v49  ;;  %v3983_v33 = vld [vmem:[#allocation8 + $0xd4] ss:$8 sps:$4 sm:$0xff]   ;;  %v3981_v47 = vld [vmem:[#allocation8 + $0xd0] ss:$8 sps:$4 sm:$0xff]  }
 0x37a   :  { %v2125_v62 = vpop.f32.mrf.mxu0  ;;  %v2191_v8 = vadd.f32 %v2186_v50, %v2175_v54  ;;  %v3984_v48 = vld [vmem:[#allocation8 + $0xc0] ss:$8 sps:$4 sm:$0xff]   ;;  %v3987_v49 = vld [vmem:[#allocation8 + $0xb0] ss:$8 sps:$4 sm:$0xff]  }
 0x37b   :  { %v2192_v63 = vadd.f32 %v2190_v46, %v2176_v56  ;;  %v2177_v1 = vmul.f32 %v2170_v38, %v2161_v57  ;;  %v2162_v4 = vmax.f32 %v2154_v58, 0.0  ;;  %v2155_v5 = vadd.f32 %v2146_v29, %v2136_v61  ;;  %v3990_v51 = vld [vmem:[#allocation8 + $0xa0] ss:$8 sps:$4 sm:$0xff]   ;;  %v3993_v54 = vld [vmem:[#allocation8 + $0x90] ss:$8 sps:$4 sm:$0xff]  }
 0x37c   :  { %v2137_v6 = vadd.f32 %v2125_v62, %v1860_v59  ;;  %v2127_v55 = vpop.f32.mrf.mxu0  ;;  %v2199_v19 = vmax.f32 %v2191_v8, 0.0  ;;  %v3998_v56 = vld [vmem:[#allocation8 + $0x84] ss:$8 sps:$4 sm:$0xff]   ;;  %v3996_v57 = vld [vmem:[#allocation8 + $0x80] ss:$8 sps:$4 sm:$0xff]   ;;  %v3999_v58 = vld [vmem:[#allocation10 + $0x78] sm:$0xff]  }
 0x37d   :  { %v2193_v9 = vadd.f32 %v2186_v50, %v2177_v1  ;;  %v2178_v11 = vmul.f32 %v2174_v39, %v2162_v4  ;;  %v2138_v12 = vadd.f32 %v2127_v55, %v1862_v52  ;;  %v2163_v60 = vmax.f32 %v2155_v5, 0.0  ;;  %v4000_v59 = vld [vmem:[#allocation10 + $0x38] sm:$0xff]   ;;  %3544 = vmatprep.subr.bf16.mxu1 %v3999_v58  ;;  %v2272_v61 = vld [vmem:[#allocation11 + $0x30] sm:$0xff] }
 0x37e   :  { %v2156_v14 = vadd.f32 %v2150_v32, %v2137_v6  ;;  %v2129_v0 = vpop.f32.mrf.mxu0  ;;  %v2200_v16 = vmax.f32 %v2192_v63, 0.0  ;;  %v2273_v62 = vld [vmem:[#allocation11 + $0x38] sm:$0xff]  ;;  %v2277_v52 = vrot.slane %v2272_v61, %v4305_v22  ;;  %v2526_v55 = vrot.slane %v2272_v61, %v4308_v26 }
 0x37f   :  { %v2194_v17 = vadd.f32 %v2190_v46, %v2178_v11  ;;  %v2157_v2 = vadd.f32 %v2146_v29, %v2138_v12  ;;  %v2139_v10 = vadd.f32 %v2129_v0, %v1864_v13  ;;  %v2201_v20 = vmax.f32 %v2193_v9, 0.0 }
 0x380   :  { %v2164_v18 = vmax.f32 %v2156_v14, 0.0  ;;  %v2179_v25 = vmul.f32 %v2170_v38, %v2163_v60  ;;  %v2281_v63 = vrot.slane %v2273_v62, %v4305_v22  ;;  %v2530_v8 = vrot.slane %v2273_v62, %v4308_v26 }
 0x381   :  { %v2202_v21 = vmax.f32 %v2194_v17, 0.0  ;;  %v2165_v24 = vmax.f32 %v2157_v2, 0.0  ;;  %v2158_v30 = vadd.f32 %v2150_v32, %v2139_v10  ;;  %v4023_v35 = vpack.c.bf16 %v2201_v20, %v2199_v19  ;;  %v3980_v32 = vld [vmem:[#allocation8 + $0xe4] ss:$8 sps:$4 sm:$0xff]  }
 0x382   :  { %v2180_v15 = vmul.f32 %v2174_v39, %v2164_v18  ;;  %v2195_v36 = vadd.f32 %v2186_v50, %v2179_v25  ;;  %2836 = vmatprep.subr.bf16.mxu0 %v3980_v32  ;;  %v2546_v12 = vrot.slane %v2273_v62, %v4310_v27  ;;  %v2542_v60 = vrot.slane %v2272_v61, %v4310_v27  ;;  %v4002_v61 = vld [vmem:[#allocation10 + $0x30] sm:$0xff]   ;;  %v4003_v62 = vld [vmem:[#allocation10 + $0x68] sm:$0xff]  }
 0x383   :  { %v2181_v31 = vmul.f32 %v2170_v38, %v2165_v24  ;;  %v2166_v34 = vmax.f32 %v2158_v30, 0.0  ;;  %v4024_v23 = vpack.c.bf16 %v2202_v21, %v2200_v16  ;;  %v3978_v38 = vld [vmem:[#allocation8 + $0xe0] ss:$8 sps:$4 sm:$0xff]  }
 0x384   :  { %v2196_v3 = vadd.f32 %v2190_v46, %v2180_v15  ;;  %v2203_v42 = vmax.f32 %v2195_v36, 0.0  ;;  %2837 = vmatpush2.bf16.msra.mxu0 %v3978_v38 }
 0x385   :  { %v2197_v37 = vadd.f32 %v2186_v50, %v2181_v31  ;;  %v2182_v40 = vmul.f32 %v2174_v39, %v2166_v34  ;;  %2494 = vmatprep.mubr.bf16.mxu1 %v4024_v23  ;;  %2838 = vmatprep.subr.bf16.mxu0 %v3983_v33  ;;  %v3986_v39 = vld [vmem:[#allocation8 + $0xc4] ss:$8 sps:$4 sm:$0xff]  }
 0x386   :  { %v2204_v41 = vmax.f32 %v2196_v3, 0.0  ;;  %2495 = vmatmul.mubr.bf16.vlgmr.msra.gmra.mxu1 %v4023_v35  ;;  %v3992_v50 = vld [vmem:[#allocation8 + $0xa4] ss:$8 sps:$4 sm:$0xff]  }
 0x387   :  { %v2198_v29 = vadd.f32 %v2190_v46, %v2182_v40  ;;  %v2205_v43 = vmax.f32 %v2197_v37, 0.0  ;;  %v3989_v46 = vld [vmem:[#allocation8 + $0xb4] ss:$8 sps:$4 sm:$0xff]   ;;  %3545 = vmatpush3.bf16.msra.mxu1 %v4000_v59 }
 0x388   :  { %2839 = vmatpush2.bf16.msra.mxu0 %v3981_v47  ;;  %v4001_v59 = vld [vmem:[#allocation10 + $0x70] sm:$0xff]  }
 0x389   :  { %v2206_v44 = vmax.f32 %v2198_v29, 0.0  ;;  %v4026_v45 = vpack.c.bf16 %v2205_v43, %v2203_v42  ;;  %2840 = vmatprep.subr.bf16.mxu0 %v3986_v39  ;;  %3546 = vmatprep.subr.bf16.mxu1 %v4001_v59 }
 0x38b   :  { %v4025_v28 = vpack.c.bf16 %v2206_v44, %v2204_v41  ;;  %3547 = vmatpush3.bf16.msra.mxu1 %v4002_v61 }
 0x38c   :  { %2841 = vmatpush2.bf16.msra.mxu0 %v3984_v48  ;;  %3548 = vmatprep.subr.bf16.mxu1 %v4003_v62 }
 0x38d   :  { %2504 = vmatprep.mubr.bf16.mxu1 %v4025_v28  ;;  %2842 = vmatprep.subr.bf16.mxu0 %v3989_v46 }
 0x38e   :  { %2505 = vmatmul.mubr.bf16.gmra.mxu1 %v4026_v45 }
 0x390   :  { %2843 = vmatpush2.bf16.msra.mxu0 %v3987_v49 }
 0x391   :  { %2844 = vmatprep.subr.bf16.mxu0 %v3992_v50 }
 0x394   :  { %2845 = vmatpush2.bf16.msra.mxu0 %v3990_v51 }
 0x395   :  { %2846 = vmatprep.subr.bf16.mxu0 %v3995_v53 }
 0x398   :  { %2847 = vmatpush2.bf16.msra.mxu0 %v3993_v54 }
 0x399   :  { %2848 = vmatprep.subr.bf16.mxu0 %v3998_v56 }
 0x39c   :  { %2849 = vmatpush2.bf16.msra.mxu0 %v3996_v57 }
 0x446   :  { %v2496_v1 = vpop.f32.mrf.mxu1 }
 0x447   :  { %v2497_v4 = vadd.f32 %v2496_v1, %v2277_v52  ;;  %v4006_v1 = vld [vmem:[#allocation10 + $0x20] sm:$0xff]  }
 0x448   :  { %v2498_v5 = vpop.f32.mrf.mxu1 }
 0x449   :  { %v2515_v6 = vmax.f32 %v2497_v4, 0.0  ;;  %v2499_v7 = vadd.f32 %v2498_v5, %v2281_v63  ;;  %v4007_v4 = vld [vmem:[#allocation10 + $0x58] sm:$0xff]  }
 0x44a   :  { %v2500_v9 = vpop.f32.mrf.mxu1  ;;  %v4008_v5 = vld [vmem:[#allocation10 + $0x18] sm:$0xff]  }
 0x44b   :  { %v2516_v11 = vmax.f32 %v2499_v7, 0.0  ;;  %v2501_v13 = vadd.f32 %v2500_v9, %v2277_v52  ;;  %v2531_v0 = vmul.f32 %v2526_v55, %v2515_v6  ;;  %v4009_v6 = vld [vmem:[#allocation10 + $0x50] sm:$0xff]   ;;  %v4011_v7 = vld [vmem:[#allocation10 + $0x48] sm:$0xff]   ;;  %v4013_v9 = vld [vmem:[#allocation10 + $0x40] sm:$0xff]  }
 0x44c   :  { %v2502_v14 = vpop.f32.mrf.mxu1 }
 0x44d   :  { %v2532_v16 = vmul.f32 %v2530_v8, %v2516_v11  ;;  %v2517_v17 = vmax.f32 %v2501_v13, 0.0  ;;  %v2503_v2 = vadd.f32 %v2502_v14, %v2281_v63  ;;  %v2547_v24 = vadd.f32 %v2542_v60, %v2531_v0  ;;  %v4014_v11 = vld [vmem:[#allocation10] sm:$0xff]   ;;  %v2629_v13 = vld [vmem:[#allocation11 + $0x48] sm:$0xff] }
 0x44e   :  { %v2506_v20 = vpop.f32.mrf.mxu1  ;;  %v2637_v14 = vrot.slane %v2629_v13, %v4305_v22 }
 0x44f   :  { %v2548_v18 = vadd.f32 %v2546_v12, %v2532_v16  ;;  %v2533_v10 = vmul.f32 %v2526_v55, %v2517_v17  ;;  %v2518_v19 = vmax.f32 %v2503_v2, 0.0  ;;  %v2507_v21 = vadd.f32 %v2506_v20, %v2277_v52 }
 0x450   :  { %v2508_v30 = vpop.f32.mrf.mxu1  ;;  %v2555_v40 = vmax.f32 %v2547_v24, 0.0  ;;  %v2886_v20 = vrot.slane %v2629_v13, %v4308_v26 }
 0x451   :  { %v2549_v25 = vadd.f32 %v2542_v60, %v2533_v10  ;;  %v2534_v15 = vmul.f32 %v2530_v8, %v2518_v19  ;;  %v2519_v31 = vmax.f32 %v2507_v21, 0.0  ;;  %v2509_v3 = vadd.f32 %v2508_v30, %v2281_v63 }
 0x452   :  { %v2556_v34 = vmax.f32 %v2548_v18, 0.0  ;;  %v2510_v23 = vpop.f32.mrf.mxu1 }
 0x453   :  { %v2550_v35 = vadd.f32 %v2546_v12, %v2534_v15  ;;  %v2520_v36 = vmax.f32 %v2509_v3, 0.0  ;;  %v2511_v37 = vadd.f32 %v2510_v23, %v2277_v52  ;;  %v2557_v41 = vmax.f32 %v2549_v25, 0.0  ;;  %v4004_v52 = vld [vmem:[#allocation10 + $0x28] sm:$0xff]  }
 0x454   :  { %v2512_v42 = vpop.f32.mrf.mxu1  ;;  %v2535_v43 = vmul.f32 %v2526_v55, %v2519_v31  ;;  %3549 = vmatpush3.bf16.msra.mxu1 %v4004_v52  ;;  %v2902_v15 = vrot.slane %v2629_v13, %v4310_v27 }
 0x455   :  { %v2558_v29 = vmax.f32 %v2550_v35, 0.0  ;;  %v2536_v44 = vmul.f32 %v2530_v8, %v2520_v36  ;;  %v2521_v28 = vmax.f32 %v2511_v37, 0.0  ;;  %v2513_v45 = vadd.f32 %v2512_v42, %v2281_v63  ;;  %v4005_v63 = vld [vmem:[#allocation10 + $0x60] sm:$0xff]  }
 0x456   :  { %v4027_v47 = vpack.c.bf16 %v2557_v41, %v2555_v40  ;;  %v2551_v48 = vadd.f32 %v2542_v60, %v2535_v43  ;;  %3550 = vmatprep.subr.bf16.mxu1 %v4005_v63 }
 0x457   :  { %v2552_v32 = vadd.f32 %v2546_v12, %v2536_v44  ;;  %v2537_v38 = vmul.f32 %v2526_v55, %v2521_v28  ;;  %v2522_v33 = vmax.f32 %v2513_v45, 0.0  ;;  %v4028_v39 = vpack.c.bf16 %v2558_v29, %v2556_v34  ;;  %v4010_v55 = vld [vmem:[#allocation10 + $0x10] sm:$0xff]  }
 0x458   :  { %v2559_v53 = vmax.f32 %v2551_v48, 0.0  ;;  %3551 = vmatpush3.bf16.msra.mxu1 %v4006_v1 }
 0x459   :  { %v2553_v46 = vadd.f32 %v2542_v60, %v2537_v38  ;;  %v2538_v49 = vmul.f32 %v2530_v8, %v2522_v33  ;;  %2850 = vmatprep.mubr.bf16.mxu0 %v4028_v39  ;;  %v2560_v50 = vmax.f32 %v2552_v32, 0.0  ;;  %3552 = vmatprep.subr.bf16.mxu1 %v4007_v4  ;;  %v4012_v8 = vld [vmem:[#allocation10 + $0x8] sm:$0xff]  }
 0x45a   :  { %2851 = vmatmul.mubr.bf16.vlgmr.msra.gmra.mxu0 %v4027_v47 }
 0x45b   :  { %v2554_v51 = vadd.f32 %v2546_v12, %v2538_v49  ;;  %v2561_v54 = vmax.f32 %v2553_v46, 0.0  ;;  %v2628_v12 = vld [vmem:[#allocation11 + $0x40] sm:$0xff] }
 0x45c   :  { %3553 = vmatpush3.bf16.msra.mxu1 %v4008_v5  ;;  %v2633_v60 = vrot.slane %v2628_v12, %v4305_v22  ;;  %v2882_v17 = vrot.slane %v2628_v12, %v4308_v26  ;;  %v2898_v10 = vrot.slane %v2628_v12, %v4310_v27  ;;  %v2984_v12 = vld [vmem:[#allocation11 + $0x50] sm:$0xff] }
 0x45d   :  { %v2562_v56 = vmax.f32 %v2554_v51, 0.0  ;;  %v4030_v58 = vpack.c.bf16 %v2561_v54, %v2559_v53  ;;  %3554 = vmatprep.subr.bf16.mxu1 %v4009_v6 }
 0x45f   :  { %v4029_v57 = vpack.c.bf16 %v2562_v56, %v2560_v50 }
 0x460   :  { %3555 = vmatpush3.bf16.msra.mxu1 %v4010_v55 }
 0x461   :  { %2860 = vmatprep.mubr.bf16.mxu0 %v4029_v57  ;;  %3556 = vmatprep.subr.bf16.mxu1 %v4011_v7 }
 0x462   :  { %2861 = vmatmul.mubr.bf16.gmra.mxu0 %v4030_v58 }
 0x464   :  { %3557 = vmatpush3.bf16.msra.mxu1 %v4012_v8 }
 0x465   :  { %3558 = vmatprep.subr.bf16.mxu1 %v4013_v9 }
 0x468   :  { %3559 = vmatpush3.bf16.msra.mxu1 %v4014_v11 }
 0x51a   :  { %v2852_v0 = vpop.f32.mrf.mxu0 }
 0x51b   :  { %v2853_v16 = vadd.f32 %v2852_v0, %v2633_v60 }
 0x51c   :  { %v2854_v2 = vpop.f32.mrf.mxu0 }
 0x51d   :  { %v2871_v18 = vmax.f32 %v2853_v16, 0.0  ;;  %v2855_v19 = vadd.f32 %v2854_v2, %v2637_v14  ;;  %v3161_v2 = vrot.slane %v2984_v12, %v4308_v26 }
 0x51e   :  { %v2856_v21 = vpop.f32.mrf.mxu0 }
 0x51f   :  { %v2887_v24 = vmul.f32 %v2882_v17, %v2871_v18  ;;  %v2872_v25 = vmax.f32 %v2855_v19, 0.0  ;;  %v2857_v30 = vadd.f32 %v2856_v21, %v2633_v60  ;;  %v3169_v19 = vrot.slane %v2984_v12, %v4310_v27 }
 0x520   :  { %v2858_v31 = vpop.f32.mrf.mxu0 }
 0x521   :  { %v2903_v3 = vadd.f32 %v2898_v10, %v2887_v24  ;;  %v2888_v34 = vmul.f32 %v2886_v20, %v2872_v25  ;;  %v2873_v35 = vmax.f32 %v2857_v30, 0.0  ;;  %v2859_v23 = vadd.f32 %v2858_v31, %v2637_v14 }
 0x522   :  { %v2862_v41 = vpop.f32.mrf.mxu0 }
 0x523   :  { %v2904_v36 = vadd.f32 %v2902_v15, %v2888_v34  ;;  %v2889_v37 = vmul.f32 %v2882_v17, %v2873_v35  ;;  %v2874_v40 = vmax.f32 %v2859_v23, 0.0  ;;  %v2863_v29 = vadd.f32 %v2862_v41, %v2633_v60 }
 0x524   :  { %v2911_v42 = vmax.f32 %v2903_v3, 0.0  ;;  %v2864_v45 = vpop.f32.mrf.mxu0 }
 0x525   :  { %v2912_v43 = vmax.f32 %v2904_v36, 0.0  ;;  %v2905_v44 = vadd.f32 %v2898_v10, %v2889_v37  ;;  %v2890_v28 = vmul.f32 %v2886_v20, %v2874_v40  ;;  %v2875_v32 = vmax.f32 %v2863_v29, 0.0 }
 0x526   :  { %v2865_v38 = vadd.f32 %v2864_v45, %v2637_v14  ;;  %v2866_v39 = vpop.f32.mrf.mxu0 }
 0x527   :  { %v3540_v33 = vpack.c.bf16 %v2912_v43, %v2911_v42  ;;  %v2906_v47 = vadd.f32 %v2902_v15, %v2890_v28  ;;  %v2891_v48 = vmul.f32 %v2882_v17, %v2875_v32  ;;  %v2867_v49 = vadd.f32 %v2866_v39, %v2633_v60 }
 0x528   :  { %v2876_v46 = vmax.f32 %v2865_v38, 0.0  ;;  %v2913_v50 = vmax.f32 %v2905_v44, 0.0  ;;  %v2868_v53 = vpop.f32.mrf.mxu0  ;;  %v2988_v60 = vrot.slane %v2984_v12, %v4305_v22 }
 0x529   :  { %2943 = vst [vmem:[#allocation2 + $0x28] sm:$0xff] %v3540_v33  ;;  %v2914_v51 = vmax.f32 %v2906_v47, 0.0  ;;  %v2907_v54 = vadd.f32 %v2898_v10, %v2891_v48  ;;  %v2877_v57 = vmax.f32 %v2867_v49, 0.0  ;;  %v2869_v58 = vadd.f32 %v2868_v53, %v2637_v14 }
 0x52a   :  { %v2892_v56 = vmul.f32 %v2886_v20, %v2876_v46  ;;  %v4031_v52 = vpack.c.bf16 %v2913_v50, %v2911_v42 }
 0x52b   :  { %v2893_v61 = vmul.f32 %v2882_v17, %v2877_v57  ;;  %v2878_v62 = vmax.f32 %v2869_v58, 0.0  ;;  %v4032_v63 = vpack.c.bf16 %v2914_v51, %v2912_v43  ;;  %v2915_v1 = vmax.f32 %v2907_v54, 0.0 }
 0x52c   :  { %v2908_v59 = vadd.f32 %v2902_v15, %v2892_v56 }
 0x52d   :  { %v2909_v5 = vadd.f32 %v2898_v10, %v2893_v61  ;;  %v2894_v6 = vmul.f32 %v2886_v20, %v2878_v62  ;;  %3137 = vmatprep.mubr.bf16.mxu1 %v4032_v63 }
 0x52e   :  { %v2916_v4 = vmax.f32 %v2908_v59, 0.0  ;;  %3138 = vmatmul.mubr.bf16.vlgmr.msra.gmra.mxu1 %v4031_v52 }
 0x52f   :  { %v2910_v55 = vadd.f32 %v2902_v15, %v2894_v6  ;;  %v2917_v7 = vmax.f32 %v2909_v5, 0.0 }
 0x531   :  { %v2918_v8 = vmax.f32 %v2910_v55, 0.0  ;;  %v4034_v11 = vpack.c.bf16 %v2917_v7, %v2915_v1 }
 0x533   :  { %v4033_v9 = vpack.c.bf16 %v2918_v8, %v2916_v4 }
 0x535   :  { %3145 = vmatprep.mubr.bf16.mxu1 %v4033_v9 }
 0x536   :  { %3146 = vmatmul.mubr.bf16.gmra.mxu1 %v4034_v11 }
 0x5ee   :  { %v3560_v13 = vpop.f32.mrf.mxu1 }
 0x5f0   :  { %v3561_v14 = vpop.f32.mrf.mxu1 }
 0x5f1   :  { %v3562_v0 = vadd.f32 %v3561_v14, %v3560_v13 }
 0x5f2   :  { %v3563_v16 = vpop.f32.mrf.mxu1 }
 0x5f3   :  { %v3140_v17 = vadd.f32 %v3562_v0, %v2988_v60 }
 0x5f4   :  { %v3564_v18 = vpop.f32.mrf.mxu1 }
 0x5f5   :  { %v3154_v10 = vmax.f32 %v3140_v17, 0.0  ;;  %v3565_v20 = vadd.f32 %v3564_v18, %v3563_v16 }
 0x5f6   :  { %v3566_v25 = vpop.f32.mrf.mxu1 }
 0x5f7   :  { %v3162_v21 = vmul.f32 %v3161_v2, %v3154_v10  ;;  %v3143_v24 = vadd.f32 %v3565_v20, %v2988_v60 }
 0x5f8   :  { %v3567_v31 = vpop.f32.mrf.mxu1 }
 0x5f9   :  { %v3170_v15 = vadd.f32 %v3169_v19, %v3162_v21  ;;  %v3155_v30 = vmax.f32 %v3143_v24, 0.0  ;;  %v3568_v3 = vadd.f32 %v3567_v31, %v3566_v25 }
 0x5fa   :  { %v3569_v34 = vpop.f32.mrf.mxu1 }
 0x5fb   :  { %3174 = vst [vmem:[%s4428_s8] sm:$0xff] %v3170_v15  ;;  %v3163_v22 = vmul.f32 %v3161_v2, %v3155_v30  ;;  %v3148_v35 = vadd.f32 %v3568_v3, %v2988_v60 }
 0x5fc   :  { %v3570_v23 = vpop.f32.mrf.mxu1 }
 0x5fd   :  { %v3171_v26 = vadd.f32 %v3169_v19, %v3163_v22  ;;  %v3156_v36 = vmax.f32 %v3148_v35, 0.0  ;;  %v3571_v37 = vadd.f32 %v3570_v23, %v3569_v34 }
 0x5ff   :  { %3175 = vst [vmem:[%s4428_s8 + $0x8] sm:$0xff] %v3171_v26  ;;  %v3164_v27 = vmul.f32 %v3161_v2, %v3156_v36  ;;  %v3151_v40 = vadd.f32 %v3571_v37, %v2988_v60 }
 0x601   :  { %v3172_v41 = vadd.f32 %v3169_v19, %v3164_v27  ;;  %v3157_v29 = vmax.f32 %v3151_v40, 0.0 }
 0x603   :  { %3176 = vst [vmem:[%s4428_s8 + $0x10] sm:$0xff] %v3172_v41  ;;  %v3165_v42 = vmul.f32 %v3161_v2, %v3157_v29 }
 0x605   :  { %v3173_v43 = vadd.f32 %v3169_v19, %v3165_v42 }
 0x607   :  { %3177 = vst [vmem:[%s4428_s8 + $0x18] sm:$0xff] %v3173_v43 }
 0x608   :  { %3182 = vsyncpa [#allocation4], 1 }
 0x609   :  { %3183 = vsyncpa [#allocation6], 1 }
 0x60a   :  { %3184 = vsyncpa [#allocation9], 1 }
 0x60b   :  { %3185 = vsyncpa [#allocation12], 1 }

</bundles_post_ra>
